<compile_context>
chip_gen: v6e
topology: v6e:2x2x1
jax: 0.10.0
libtpu: 0.0.40
codegen_flags: <defaults>
</compile_context>

<pallas_src>
import functools
import math

import numpy as np
import jax
import jax.numpy as jnp
from jax.experimental import pallas as pl
from jax.experimental.pallas import tpu as pltpu


# -----------------------------------------------------------------------------
# small helpers (pure jnp, safe inside Mosaic)
# -----------------------------------------------------------------------------
def _erf(x):
    # Abramowitz & Stegun 7.1.26 (max abs err ~1.5e-7): exact-erf GELU without
    # relying on a lax.erf lowering inside the kernel.
    a1, a2, a3, a4, a5 = (0.254829592, -0.284496736, 1.421413741,
                          -1.453152027, 1.061405429)
    p = 0.3275911
    sgn = jnp.where(x >= 0.0, 1.0, -1.0)
    ax = jnp.abs(x)
    t = 1.0 / (1.0 + p * ax)
    poly = ((((a5 * t + a4) * t + a3) * t + a2) * t + a1) * t
    return sgn * (1.0 - poly * jnp.exp(-ax * ax))


def _gelu_exact(x):
    return 0.5 * x * (1.0 + _erf(x * (1.0 / math.sqrt(2.0))))


def _layer_norm(v, g, b, eps=1e-5):   # torch LayerNorm default eps
    m = jnp.mean(v, axis=-1, keepdims=True)
    var = jnp.mean((v - m) ** 2, axis=-1, keepdims=True)
    return (v - m) * jax.lax.rsqrt(var + eps) * g + b


def _pack_lane_dense(x2d, out_dtype):
    # (R, C) -> (R*C//128, 128): concat aligned sublane chunks along lanes so
    # the HBM store is a full 128-lane vst (review item: lane-dense outputs).
    R, C = x2d.shape
    if C % 128 == 0:
        return x2d.astype(out_dtype)
    group = 128 // C
    rows = R // group
    return jnp.concatenate(
        [x2d[j * rows:(j + 1) * rows, :] for j in range(group)],
        axis=1).astype(out_dtype)


def _unpack_lane_dense(slab, B, T, C):
    # wrapper-side (XLA) inverse of _pack_lane_dense.
    if C % 128 == 0:
        return slab.reshape(B, T, C)
    group = 128 // C
    x2d = jnp.concatenate(
        [slab[:, j * C:(j + 1) * C] for j in range(group)], axis=0)
    return x2d.reshape(B, T, C)


# -----------------------------------------------------------------------------
# Kernel: one grid step == one encoder layer (conv + outer LN done at step 0)
# -----------------------------------------------------------------------------
def w2v2_layer_kernel(xpad_ref, cw_ref, cb_ref, lng_ref, lnb_ref,
                      wqkv_ref, bqkv_ref, wo_ref, bo_ref,
                      l1g_ref, l1b_ref, w1_ref, b1_ref,
                      w2_ref, b2_ref, l2g_ref, l2b_ref,
                      out_ref, feat_ref, x_scr,
                      *, num_heads, conv_pos, layer_use):
    l = pl.program_id(0)
    B, Tp, C = xpad_ref.shape
    K = conv_pos
    pad = K // 2
    T = Tp - 2 * pad
    BT = B * T
    Dh = C // num_heads
    scaling = Dh ** -0.5
    f32 = jnp.float32
    bf16 = jnp.bfloat16

    # --- step 0: positional conv (+ exact GELU) + residual + outer LayerNorm --
    @pl.when(l == 0)
    def _init():
        conv = jnp.zeros((BT, C), f32)
        for kk in range(K):                                    # K tap matmuls
            tap = xpad_ref[:, kk:kk + T, :].reshape(BT, C)     # static sublane slice
            conv = conv + jnp.dot(tap.astype(bf16), cw_ref[kk],
                                  preferred_element_type=f32)
        conv = _gelu_exact(conv + cb_ref[...])
        x_res = xpad_ref[:, pad:pad + T, :].reshape(BT, C).astype(f32)
        x_scr[...] = _layer_norm(x_res + conv, lng_ref[...], lnb_ref[...])

    # --- one encoder layer (layer_norm_first=False path) ----------------------
    x = x_scr[...]                                             # (BT, C) f32
    residual = x

    # fused QKV projection: one (BT, C) @ (C, 3C) matmul
    qkv = jnp.dot(x.astype(bf16), wqkv_ref[0],
                  preferred_element_type=f32) + bqkv_ref[0]
    q = qkv[:, :C] * scaling
    kx = qkv[:, C:2 * C]
    vx = qkv[:, 2 * C:]

    # per-head attention, batched over B via einsum; contexts concatenated so a
    # single W_out matmul is done (no per-head W_out accumulation).
    ctx_heads = []
    for h in range(num_heads):
        lo, hi = h * Dh, (h + 1) * Dh
        qh = q[:, lo:hi].reshape(B, T, Dh)
        kh = kx[:, lo:hi].reshape(B, T, Dh)
        vh = vx[:, lo:hi].reshape(B, T, Dh)
        s = jnp.einsum('bqd,bkd->bqk', qh.astype(bf16), kh.astype(bf16),
                       preferred_element_type=f32)             # (B, T, T)
        s = s - jnp.max(s, axis=-1, keepdims=True)
        p = jnp.exp(s)
        p = p * pl.reciprocal(jnp.sum(p, axis=-1, keepdims=True), approx=True)
        c = jnp.einsum('bqk,bkd->bqd', p.astype(bf16), vh.astype(bf16),
                       preferred_element_type=f32)             # (B, T, Dh)
        ctx_heads.append(c.reshape(BT, Dh))
    ctx = jnp.concatenate(ctx_heads, axis=-1)                  # (BT, C)

    attn = jnp.dot(ctx.astype(bf16), wo_ref[0],
                   preferred_element_type=f32) + bo_ref[0]
    x = _layer_norm(residual + attn, l1g_ref[0], l1b_ref[0])   # self_attn LN

    residual = x
    h1 = jnp.dot(x.astype(bf16), w1_ref[0],
                 preferred_element_type=f32) + b1_ref[0]
    h1 = jnp.maximum(h1, 0.0)                                  # relu
    h2 = jnp.dot(h1.astype(bf16), w2_ref[0],
                 preferred_element_type=f32) + b2_ref[0]
    x = _layer_norm(residual + h2, l2g_ref[0], l2b_ref[0])     # final LN
    x_scr[...] = x

    @pl.when(l == layer_use)
    def _store_feat():
        feat_ref[...] = _pack_lane_dense(x, feat_ref.dtype)

    @pl.when(l == pl.num_programs(0) - 1)
    def _store_out():
        out_ref[...] = _pack_lane_dense(x, out_ref.dtype)


# -----------------------------------------------------------------------------
# Wrapper
# -----------------------------------------------------------------------------
def transformer_encoder_forward(x, params, *, num_heads, conv_pos, layer_use):
    """Replicates TransformerEncoder.forward (eval, layer_norm_first=False,
    padding_mask=None, superb=False, tgt_layer=None).  Returns (x, layer_feats)."""
    B, T, C = x.shape
    K = conv_pos
    pad = K // 2
    L = params["wqkv"].shape[0]
    FF = params["w1"].shape[2]
    assert layer_use < L
    assert 128 % C == 0 and (B * T) % (128 // C) == 0, \
        "lane-dense output packing assumes C divides 128 at these small dims"
    out_rows = (B * T * C) // 128

    x_pad = jnp.pad(x, ((0, 0), (pad, pad), (0, 0)))           # no im2col blowup

    bf16 = jnp.bfloat16
    cw = params["conv_w"].astype(bf16)                         # MXU operands bf16
    wqkv = params["wqkv"].astype(bf16)
    wo = params["wo"].astype(bf16)
    w1 = params["w1"].astype(bf16)
    w2 = params["w2"].astype(bf16)

    kern = functools.partial(w2v2_layer_kernel, num_heads=num_heads,
                             conv_pos=conv_pos, layer_use=layer_use)

    def const(shape):
        n = len(shape)
        return pl.BlockSpec(shape, lambda l, _n=n: (0,) * _n)

    def per_layer(shape):                                      # shape excludes L dim
        n = len(shape)
        return pl.BlockSpec((1,) + shape, lambda l, _n=n: (l,) + (0,) * _n)

    out, feat = pl.pallas_call(
        kern,
        out_shape=(jax.ShapeDtypeStruct((out_rows, 128), x.dtype),
                   jax.ShapeDtypeStruct((out_rows, 128), x.dtype)),
        grid=(L,),
        in_specs=[
            const((B, T + 2 * pad, C)),                        # zero-padded input
            const((K, C, C)), const((1, C)),                   # conv per-tap W, b
            const((1, C)), const((1, C)),                      # outer LayerNorm
            per_layer((C, 3 * C)), per_layer((1, 3 * C)),      # fused QKV
            per_layer((C, C)), per_layer((1, C)),              # out proj
            per_layer((1, C)), per_layer((1, C)),              # self_attn LN
            per_layer((C, FF)), per_layer((1, FF)),            # fc1
            per_layer((FF, C)), per_layer((1, C)),             # fc2
            per_layer((1, C)), per_layer((1, C)),              # final LN
        ],
        out_specs=(pl.BlockSpec((out_rows, 128), lambda l: (0, 0)),
                   pl.BlockSpec((out_rows, 128), lambda l: (0, 0))),
        scratch_shapes=[pltpu.VMEM((B * T, C), jnp.float32)],  # activation carry
        compiler_params=pltpu.CompilerParams(
            dimension_semantics=("arbitrary",),                # layer axis is sequential
            vmem_limit_bytes=32 * 1024 * 1024),
    )(x_pad, cw, params["conv_b"], params["ln_g"], params["ln_b"],
      wqkv, params["bqkv"], wo, params["bo"],
      params["ln1_g"], params["ln1_b"], w1, params["b1"],
      w2, params["b2"], params["ln2_g"], params["ln2_b"])

    return (_unpack_lane_dense(out, B, T, C),
            _unpack_lane_dense(feat, B, T, C))


# -----------------------------------------------------------------------------
# Deterministic synthetic parameters (mirrors module __init__ shapes / init)
# -----------------------------------------------------------------------------
def init_params(key, *, C, FF, conv_pos, groups, num_layers):
    keys = jax.random.split(key, 1 + num_layers * 6)
    ki = 0
    K = conv_pos
    cg = C // groups
    std = math.sqrt(4.0 / (K * C))
    v = np.asarray(jax.random.normal(keys[ki], (C, cg, K), jnp.float32)) * std
    ki += 1
    # weight_norm(dim=2): at init w == v.
    # TODO(synk): when loading trained torch weights, apply g / ||v|| (dim=2)
    # before expanding the grouped weight to the dense per-tap form.
    w_tap = np.zeros((K, C, C), np.float32)                    # (tap, C_in, C_out)
    for o in range(C):
        grp = o // cg
        w_tap[:, grp * cg:(grp + 1) * cg, o] = v[o].T          # v[o] is (cg, K)
    conv_w = jnp.asarray(w_tap)
    conv_b = jnp.zeros((1, C), jnp.float32)
    ln_g = jnp.ones((1, C), jnp.float32)
    ln_b = jnp.zeros((1, C), jnp.float32)

    def lin(k, d_in, d_out):
        # init_bert_params: normal(0, 0.02), bias 0; stored (in, out): y = x@W + b
        return (jax.random.normal(k, (d_in, d_out), jnp.float32) * 0.02,
                jnp.zeros((1, d_out), jnp.float32))

    layers = []
    for _ in range(num_layers):
        wq, bq = lin(keys[ki], C, C); ki += 1
        wk, bk = lin(keys[ki], C, C); ki += 1
        wv, bv = lin(keys[ki], C, C); ki += 1
        wo, bo = lin(keys[ki], C, C); ki += 1
        w1, b1 = lin(keys[ki], C, FF); ki += 1
        w2, b2 = lin(keys[ki], FF, C); ki += 1
        layers.append(dict(
            wqkv=jnp.concatenate([wq, wk, wv], axis=1),        # fused QKV (C, 3C)
            bqkv=jnp.concatenate([bq, bk, bv], axis=1),
            wo=wo, bo=bo,
            ln1_g=jnp.ones((1, C), jnp.float32), ln1_b=jnp.zeros((1, C), jnp.float32),
            w1=w1, b1=b1, w2=w2, b2=b2,
            ln2_g=jnp.ones((1, C), jnp.float32), ln2_b=jnp.zeros((1, C), jnp.float32)))

    stacked = {name: jnp.stack([ly[name] for ly in layers]) for name in layers[0]}
    stacked.update(conv_w=conv_w, conv_b=conv_b, ln_g=ln_g, ln_b=ln_b)
    return stacked


# -----------------------------------------------------------------------------
if __name__ == "__main__":
    # small config consistent with the module
    B, T, C = 2, 16, 32
    H = 4
    FF = 64
    CONV_POS = 8
    CONV_GROUPS = 4
    NUM_LAYERS = 3
    LAYER_USE = 1

    key = jax.random.PRNGKey(0)
    k_x, k_p = jax.random.split(key)
    x = jax.random.normal(k_x, (B, T, C), jnp.float32)
    params = init_params(k_p, C=C, FF=FF, conv_pos=CONV_POS,
                         groups=CONV_GROUPS, num_layers=NUM_LAYERS)

    fwd = jax.jit(functools.partial(transformer_encoder_forward,
                                    num_heads=H, conv_pos=CONV_POS,
                                    layer_use=LAYER_USE))
    out, layer_feats = fwd(x, params)
    out = jax.block_until_ready(out)
    layer_feats = jax.block_until_ready(layer_feats)

    assert out.shape == (B, T, C) and layer_feats.shape == (B, T, C)
    assert bool(jnp.all(jnp.isfinite(out))) and bool(jnp.all(jnp.isfinite(layer_feats)))
    # TODO(synk): dropout / layerdrop are training-only; eval mode makes them no-ops.
    print("KERNEL_OK")
</pallas_src>

<mosaic_0001>
module attributes {stable_mosaic.version = 11 : i64} {
  func.func @w2v2_layer_kernel(%arg0: i32, %arg1: memref<2x24x32xf32, #tpu.memory_space<vmem>>, %arg2: memref<8x32x32xbf16, #tpu.memory_space<vmem>>, %arg3: memref<1x32xf32, #tpu.memory_space<vmem>>, %arg4: memref<1x32xf32, #tpu.memory_space<vmem>>, %arg5: memref<1x32xf32, #tpu.memory_space<vmem>>, %arg6: memref<1x32x96xbf16, #tpu.memory_space<vmem>>, %arg7: memref<1x1x96xf32, #tpu.memory_space<vmem>>, %arg8: memref<1x32x32xbf16, #tpu.memory_space<vmem>>, %arg9: memref<1x1x32xf32, #tpu.memory_space<vmem>>, %arg10: memref<1x1x32xf32, #tpu.memory_space<vmem>>, %arg11: memref<1x1x32xf32, #tpu.memory_space<vmem>>, %arg12: memref<1x32x64xbf16, #tpu.memory_space<vmem>>, %arg13: memref<1x1x64xf32, #tpu.memory_space<vmem>>, %arg14: memref<1x64x32xbf16, #tpu.memory_space<vmem>>, %arg15: memref<1x1x32xf32, #tpu.memory_space<vmem>>, %arg16: memref<1x1x32xf32, #tpu.memory_space<vmem>>, %arg17: memref<1x1x32xf32, #tpu.memory_space<vmem>>, %arg18: memref<8x128xf32, #tpu.memory_space<vmem>>, %arg19: memref<8x128xf32, #tpu.memory_space<vmem>>, %arg20: memref<32x32xf32, #tpu.memory_space<vmem>>) attributes {dimension_semantics = [#tpu.dimension_semantics<arbitrary>], iteration_bounds = array<i64: 3>, scalar_prefetch = 0 : i64, scratch_operands = 1 : i64, tpu.core_type = #tpu.core_type<tc>, window_params = [{pipeline_mode = #tpu.pipeline_mode<synchronous>, transform_indices = @transform_0, window_bounds = array<i64: 2, 24, 32>}, {pipeline_mode = #tpu.pipeline_mode<synchronous>, transform_indices = @transform_1, window_bounds = array<i64: 8, 32, 32>}, {pipeline_mode = #tpu.pipeline_mode<synchronous>, transform_indices = @transform_2, window_bounds = array<i64: 1, 32>}, {pipeline_mode = #tpu.pipeline_mode<synchronous>, transform_indices = @transform_3, window_bounds = array<i64: 1, 32>}, {pipeline_mode = #tpu.pipeline_mode<synchronous>, transform_indices = @transform_4, window_bounds = array<i64: 1, 32>}, {transform_indices = @transform_5, window_bounds = array<i64: 1, 32, 96>}, {transform_indices = @transform_6, window_bounds = array<i64: 1, 1, 96>}, {transform_indices = @transform_7, window_bounds = array<i64: 1, 32, 32>}, {transform_indices = @transform_8, window_bounds = array<i64: 1, 1, 32>}, {transform_indices = @transform_9, window_bounds = array<i64: 1, 1, 32>}, {transform_indices = @transform_10, window_bounds = array<i64: 1, 1, 32>}, {transform_indices = @transform_11, window_bounds = array<i64: 1, 32, 64>}, {transform_indices = @transform_12, window_bounds = array<i64: 1, 1, 64>}, {transform_indices = @transform_13, window_bounds = array<i64: 1, 64, 32>}, {transform_indices = @transform_14, window_bounds = array<i64: 1, 1, 32>}, {transform_indices = @transform_15, window_bounds = array<i64: 1, 1, 32>}, {transform_indices = @transform_16, window_bounds = array<i64: 1, 1, 32>}, {pipeline_mode = #tpu.pipeline_mode<synchronous>, transform_indices = @transform_17, window_bounds = array<i64: 8, 128>}, {pipeline_mode = #tpu.pipeline_mode<synchronous>, transform_indices = @transform_18, window_bounds = array<i64: 8, 128>}]} {
    %c0_i32 = arith.constant 0 : i32
    %0 = arith.cmpi eq, %arg0, %c0_i32 : i32
    %1 = arith.extui %0 : i1 to i32
    %c0_i32_0 = arith.constant 0 : i32
    %2 = arith.cmpi ne, %1, %c0_i32_0 : i32
    scf.if %2 {
      %cst_73 = arith.constant 0.000000e+00 : f32
      %197 = vector.broadcast %cst_73 : f32 to vector<32x32xf32>
      %c0_74 = arith.constant 0 : index
      %c0_75 = arith.constant 0 : index
      %c0_76 = arith.constant 0 : index
      %198 = vector.load %arg1[%c0_74, %c0_75, %c0_76] : memref<2x24x32xf32, #tpu.memory_space<vmem>>, vector<2x16x32xf32>
      %199 = vector.shape_cast %198 : vector<2x16x32xf32> to vector<32x32xf32>
      %200 = arith.truncf %199 : vector<32x32xf32> to vector<32x32xbf16>
      %c0_77 = arith.constant 0 : index
      %c0_78 = arith.constant 0 : index
      %c0_79 = arith.constant 0 : index
      %201 = vector.load %arg2[%c0_77, %c0_78, %c0_79] : memref<8x32x32xbf16, #tpu.memory_space<vmem>>, vector<1x32x32xbf16>
      %202 = vector.shape_cast %201 : vector<1x32x32xbf16> to vector<32x32xbf16>
      %cst_80 = arith.constant dense<0.000000e+00> : vector<32x32xf32>
      %203 = tpu.matmul %200, %202, %cst_80 {dimension_numbers = #tpu.dot_dimension_numbers<[1], [0], [0], [1], [0, 0, 1, 1], [], []>} : vector<32x32xbf16>, vector<32x32xbf16>, vector<32x32xf32> -> vector<32x32xf32>
      %204 = arith.addf %197, %203 : vector<32x32xf32>
      %c0_81 = arith.constant 0 : index
      %c1 = arith.constant 1 : index
      %c0_82 = arith.constant 0 : index
      %205 = vector.load %arg1[%c0_81, %c1, %c0_82] : memref<2x24x32xf32, #tpu.memory_space<vmem>>, vector<2x16x32xf32>
      %206 = vector.shape_cast %205 : vector<2x16x32xf32> to vector<32x32xf32>
      %207 = arith.truncf %206 : vector<32x32xf32> to vector<32x32xbf16>
      %c1_83 = arith.constant 1 : index
      %c0_84 = arith.constant 0 : index
      %c0_85 = arith.constant 0 : index
      %208 = vector.load %arg2[%c1_83, %c0_84, %c0_85] : memref<8x32x32xbf16, #tpu.memory_space<vmem>>, vector<1x32x32xbf16>
      %209 = vector.shape_cast %208 : vector<1x32x32xbf16> to vector<32x32xbf16>
      %cst_86 = arith.constant dense<0.000000e+00> : vector<32x32xf32>
      %210 = tpu.matmul %207, %209, %cst_86 {dimension_numbers = #tpu.dot_dimension_numbers<[1], [0], [0], [1], [0, 0, 1, 1], [], []>} : vector<32x32xbf16>, vector<32x32xbf16>, vector<32x32xf32> -> vector<32x32xf32>
      %211 = arith.addf %204, %210 : vector<32x32xf32>
      %c0_87 = arith.constant 0 : index
      %c2 = arith.constant 2 : index
      %c0_88 = arith.constant 0 : index
      %212 = vector.load %arg1[%c0_87, %c2, %c0_88] : memref<2x24x32xf32, #tpu.memory_space<vmem>>, vector<2x16x32xf32>
      %213 = vector.shape_cast %212 : vector<2x16x32xf32> to vector<32x32xf32>
      %214 = arith.truncf %213 : vector<32x32xf32> to vector<32x32xbf16>
      %c2_89 = arith.constant 2 : index
      %c0_90 = arith.constant 0 : index
      %c0_91 = arith.constant 0 : index
      %215 = vector.load %arg2[%c2_89, %c0_90, %c0_91] : memref<8x32x32xbf16, #tpu.memory_space<vmem>>, vector<1x32x32xbf16>
      %216 = vector.shape_cast %215 : vector<1x32x32xbf16> to vector<32x32xbf16>
      %cst_92 = arith.constant dense<0.000000e+00> : vector<32x32xf32>
      %217 = tpu.matmul %214, %216, %cst_92 {dimension_numbers = #tpu.dot_dimension_numbers<[1], [0], [0], [1], [0, 0, 1, 1], [], []>} : vector<32x32xbf16>, vector<32x32xbf16>, vector<32x32xf32> -> vector<32x32xf32>
      %218 = arith.addf %211, %217 : vector<32x32xf32>
      %c0_93 = arith.constant 0 : index
      %c3 = arith.constant 3 : index
      %c0_94 = arith.constant 0 : index
      %219 = vector.load %arg1[%c0_93, %c3, %c0_94] : memref<2x24x32xf32, #tpu.memory_space<vmem>>, vector<2x16x32xf32>
      %220 = vector.shape_cast %219 : vector<2x16x32xf32> to vector<32x32xf32>
      %221 = arith.truncf %220 : vector<32x32xf32> to vector<32x32xbf16>
      %c3_95 = arith.constant 3 : index
      %c0_96 = arith.constant 0 : index
      %c0_97 = arith.constant 0 : index
      %222 = vector.load %arg2[%c3_95, %c0_96, %c0_97] : memref<8x32x32xbf16, #tpu.memory_space<vmem>>, vector<1x32x32xbf16>
      %223 = vector.shape_cast %222 : vector<1x32x32xbf16> to vector<32x32xbf16>
      %cst_98 = arith.constant dense<0.000000e+00> : vector<32x32xf32>
      %224 = tpu.matmul %221, %223, %cst_98 {dimension_numbers = #tpu.dot_dimension_numbers<[1], [0], [0], [1], [0, 0, 1, 1], [], []>} : vector<32x32xbf16>, vector<32x32xbf16>, vector<32x32xf32> -> vector<32x32xf32>
      %225 = arith.addf %218, %224 : vector<32x32xf32>
      %c0_99 = arith.constant 0 : index
      %c4 = arith.constant 4 : index
      %c0_100 = arith.constant 0 : index
      %226 = vector.load %arg1[%c0_99, %c4, %c0_100] : memref<2x24x32xf32, #tpu.memory_space<vmem>>, vector<2x16x32xf32>
      %227 = vector.shape_cast %226 : vector<2x16x32xf32> to vector<32x32xf32>
      %228 = arith.truncf %227 : vector<32x32xf32> to vector<32x32xbf16>
      %c4_101 = arith.constant 4 : index
      %c0_102 = arith.constant 0 : index
      %c0_103 = arith.constant 0 : index
      %229 = vector.load %arg2[%c4_101, %c0_102, %c0_103] : memref<8x32x32xbf16, #tpu.memory_space<vmem>>, vector<1x32x32xbf16>
      %230 = vector.shape_cast %229 : vector<1x32x32xbf16> to vector<32x32xbf16>
      %cst_104 = arith.constant dense<0.000000e+00> : vector<32x32xf32>
      %231 = tpu.matmul %228, %230, %cst_104 {dimension_numbers = #tpu.dot_dimension_numbers<[1], [0], [0], [1], [0, 0, 1, 1], [], []>} : vector<32x32xbf16>, vector<32x32xbf16>, vector<32x32xf32> -> vector<32x32xf32>
      %232 = arith.addf %225, %231 : vector<32x32xf32>
      %c0_105 = arith.constant 0 : index
      %c5 = arith.constant 5 : index
      %c0_106 = arith.constant 0 : index
      %233 = vector.load %arg1[%c0_105, %c5, %c0_106] : memref<2x24x32xf32, #tpu.memory_space<vmem>>, vector<2x16x32xf32>
      %234 = vector.shape_cast %233 : vector<2x16x32xf32> to vector<32x32xf32>
      %235 = arith.truncf %234 : vector<32x32xf32> to vector<32x32xbf16>
      %c5_107 = arith.constant 5 : index
      %c0_108 = arith.constant 0 : index
      %c0_109 = arith.constant 0 : index
      %236 = vector.load %arg2[%c5_107, %c0_108, %c0_109] : memref<8x32x32xbf16, #tpu.memory_space<vmem>>, vector<1x32x32xbf16>
      %237 = vector.shape_cast %236 : vector<1x32x32xbf16> to vector<32x32xbf16>
      %cst_110 = arith.constant dense<0.000000e+00> : vector<32x32xf32>
      %238 = tpu.matmul %235, %237, %cst_110 {dimension_numbers = #tpu.dot_dimension_numbers<[1], [0], [0], [1], [0, 0, 1, 1], [], []>} : vector<32x32xbf16>, vector<32x32xbf16>, vector<32x32xf32> -> vector<32x32xf32>
      %239 = arith.addf %232, %238 : vector<32x32xf32>
      %c0_111 = arith.constant 0 : index
      %c6 = arith.constant 6 : index
      %c0_112 = arith.constant 0 : index
      %240 = vector.load %arg1[%c0_111, %c6, %c0_112] : memref<2x24x32xf32, #tpu.memory_space<vmem>>, vector<2x16x32xf32>
      %241 = vector.shape_cast %240 : vector<2x16x32xf32> to vector<32x32xf32>
      %242 = arith.truncf %241 : vector<32x32xf32> to vector<32x32xbf16>
      %c6_113 = arith.constant 6 : index
      %c0_114 = arith.constant 0 : index
      %c0_115 = arith.constant 0 : index
      %243 = vector.load %arg2[%c6_113, %c0_114, %c0_115] : memref<8x32x32xbf16, #tpu.memory_space<vmem>>, vector<1x32x32xbf16>
      %244 = vector.shape_cast %243 : vector<1x32x32xbf16> to vector<32x32xbf16>
      %cst_116 = arith.constant dense<0.000000e+00> : vector<32x32xf32>
      %245 = tpu.matmul %242, %244, %cst_116 {dimension_numbers = #tpu.dot_dimension_numbers<[1], [0], [0], [1], [0, 0, 1, 1], [], []>} : vector<32x32xbf16>, vector<32x32xbf16>, vector<32x32xf32> -> vector<32x32xf32>
      %246 = arith.addf %239, %245 : vector<32x32xf32>
      %c0_117 = arith.constant 0 : index
      %c7 = arith.constant 7 : index
      %c0_118 = arith.constant 0 : index
      %247 = vector.load %arg1[%c0_117, %c7, %c0_118] : memref<2x24x32xf32, #tpu.memory_space<vmem>>, vector<2x16x32xf32>
      %248 = vector.shape_cast %247 : vector<2x16x32xf32> to vector<32x32xf32>
      %249 = arith.truncf %248 : vector<32x32xf32> to vector<32x32xbf16>
      %c7_119 = arith.constant 7 : index
      %c0_120 = arith.constant 0 : index
      %c0_121 = arith.constant 0 : index
      %250 = vector.load %arg2[%c7_119, %c0_120, %c0_121] : memref<8x32x32xbf16, #tpu.memory_space<vmem>>, vector<1x32x32xbf16>
      %251 = vector.shape_cast %250 : vector<1x32x32xbf16> to vector<32x32xbf16>
      %cst_122 = arith.constant dense<0.000000e+00> : vector<32x32xf32>
      %252 = tpu.matmul %249, %251, %cst_122 {dimension_numbers = #tpu.dot_dimension_numbers<[1], [0], [0], [1], [0, 0, 1, 1], [], []>} : vector<32x32xbf16>, vector<32x32xbf16>, vector<32x32xf32> -> vector<32x32xf32>
      %253 = arith.addf %246, %252 : vector<32x32xf32>
      %c0_123 = arith.constant 0 : index
      %c0_124 = arith.constant 0 : index
      %254 = vector.load %arg3[%c0_123, %c0_124] : memref<1x32xf32, #tpu.memory_space<vmem>>, vector<1x32xf32>
      %255 = vector.broadcast %254 : vector<1x32xf32> to vector<32x32xf32>
      %256 = arith.addf %253, %255 : vector<32x32xf32>
      %cst_125 = arith.constant 5.000000e-01 : f32
      %257 = vector.broadcast %cst_125 : f32 to vector<32x32xf32>
      %258 = arith.mulf %257, %256 : vector<32x32xf32>
      %cst_126 = arith.constant 0.707106769 : f32
      %259 = vector.broadcast %cst_126 : f32 to vector<32x32xf32>
      %260 = arith.mulf %256, %259 : vector<32x32xf32>
      %cst_127 = arith.constant 0.000000e+00 : f32
      %261 = vector.broadcast %cst_127 : f32 to vector<32x32xf32>
      %262 = arith.cmpf oge, %260, %261 : vector<32x32xf32>
      %cst_128 = arith.constant 1.000000e+00 : f32
      %cst_129 = arith.constant -1.000000e+00 : f32
      %263 = vector.broadcast %cst_128 : f32 to vector<32x32xf32>
      %264 = vector.broadcast %cst_129 : f32 to vector<32x32xf32>
      %265 = arith.select %262, %263, %264 : vector<32x32xi1>, vector<32x32xf32>
      %266 = math.absf %260 : vector<32x32xf32>
      %cst_130 = arith.constant 0.327591091 : f32
      %267 = vector.broadcast %cst_130 : f32 to vector<32x32xf32>
      %268 = arith.mulf %267, %266 : vector<32x32xf32>
      %cst_131 = arith.constant 1.000000e+00 : f32
      %269 = vector.broadcast %cst_131 : f32 to vector<32x32xf32>
      %270 = arith.addf %269, %268 : vector<32x32xf32>
      %cst_132 = arith.constant 1.000000e+00 : f32
      %271 = vector.broadcast %cst_132 : f32 to vector<32x32xf32>
      %272 = arith.divf %271, %270 : vector<32x32xf32>
      %cst_133 = arith.constant 1.06140542 : f32
      %273 = vector.broadcast %cst_133 : f32 to vector<32x32xf32>
      %274 = arith.mulf %273, %272 : vector<32x32xf32>
      %cst_134 = arith.constant -1.45315206 : f32
      %275 = vector.broadcast %cst_134 : f32 to vector<32x32xf32>
      %276 = arith.addf %274, %275 : vector<32x32xf32>
      %277 = arith.mulf %276, %272 : vector<32x32xf32>
      %cst_135 = arith.constant 1.42141378 : f32
      %278 = vector.broadcast %cst_135 : f32 to vector<32x32xf32>
      %279 = arith.addf %277, %278 : vector<32x32xf32>
      %280 = arith.mulf %279, %272 : vector<32x32xf32>
      %cst_136 = arith.constant -0.284496725 : f32
      %281 = vector.broadcast %cst_136 : f32 to vector<32x32xf32>
      %282 = arith.addf %280, %281 : vector<32x32xf32>
      %283 = arith.mulf %282, %272 : vector<32x32xf32>
      %cst_137 = arith.constant 0.254829586 : f32
      %284 = vector.broadcast %cst_137 : f32 to vector<32x32xf32>
      %285 = arith.addf %283, %284 : vector<32x32xf32>
      %286 = arith.mulf %285, %272 : vector<32x32xf32>
      %cst_138 = arith.constant 0.000000e+00 : f32
      %287 = vector.broadcast %cst_138 : f32 to vector<32x32xf32>
      %288 = arith.subf %287, %266 : vector<32x32xf32>
      %289 = arith.mulf %288, %266 : vector<32x32xf32>
      %290 = math.exp %289 : vector<32x32xf32>
      %291 = arith.mulf %286, %290 : vector<32x32xf32>
      %cst_139 = arith.constant 1.000000e+00 : f32
      %292 = vector.broadcast %cst_139 : f32 to vector<32x32xf32>
      %293 = arith.subf %292, %291 : vector<32x32xf32>
      %294 = arith.mulf %265, %293 : vector<32x32xf32>
      %cst_140 = arith.constant 1.000000e+00 : f32
      %295 = vector.broadcast %cst_140 : f32 to vector<32x32xf32>
      %296 = arith.addf %295, %294 : vector<32x32xf32>
      %297 = arith.mulf %258, %296 : vector<32x32xf32>
      %c0_141 = arith.constant 0 : index
      %c4_142 = arith.constant 4 : index
      %c0_143 = arith.constant 0 : index
      %298 = vector.load %arg1[%c0_141, %c4_142, %c0_143] : memref<2x24x32xf32, #tpu.memory_space<vmem>>, vector<2x16x32xf32>
      %299 = vector.shape_cast %298 : vector<2x16x32xf32> to vector<32x32xf32>
      %300 = arith.addf %299, %297 : vector<32x32xf32>
      %c0_144 = arith.constant 0 : index
      %c0_145 = arith.constant 0 : index
      %301 = vector.load %arg4[%c0_144, %c0_145] : memref<1x32xf32, #tpu.memory_space<vmem>>, vector<1x32xf32>
      %c0_146 = arith.constant 0 : index
      %c0_147 = arith.constant 0 : index
      %302 = vector.load %arg5[%c0_146, %c0_147] : memref<1x32xf32, #tpu.memory_space<vmem>>, vector<1x32xf32>
      %cst_148 = arith.constant dense<0.000000e+00> : vector<32xf32>
      %303 = vector.multi_reduction <add>, %300, %cst_148 [1] : vector<32x32xf32> to vector<32xf32>
      %304 = vector.shape_cast %303 : vector<32xf32> to vector<32x1xf32>
      %cst_149 = arith.constant 3.200000e+01 : f32
      %305 = vector.broadcast %cst_149 : f32 to vector<32x1xf32>
      %306 = arith.divf %304, %305 : vector<32x1xf32>
      %307 = vector.broadcast %306 : vector<32x1xf32> to vector<32x32xf32>
      %308 = arith.subf %300, %307 : vector<32x32xf32>
      %309 = arith.mulf %308, %308 : vector<32x32xf32>
      %cst_150 = arith.constant dense<0.000000e+00> : vector<32xf32>
      %310 = vector.multi_reduction <add>, %309, %cst_150 [1] : vector<32x32xf32> to vector<32xf32>
      %311 = vector.shape_cast %310 : vector<32xf32> to vector<32x1xf32>
      %cst_151 = arith.constant 3.200000e+01 : f32
      %312 = vector.broadcast %cst_151 : f32 to vector<32x1xf32>
      %313 = arith.divf %311, %312 : vector<32x1xf32>
      %314 = vector.broadcast %306 : vector<32x1xf32> to vector<32x32xf32>
      %315 = arith.subf %300, %314 : vector<32x32xf32>
      %cst_152 = arith.constant 9.99999974E-6 : f32
      %316 = vector.broadcast %cst_152 : f32 to vector<32x1xf32>
      %317 = arith.addf %313, %316 : vector<32x1xf32>
      %318 = math.rsqrt %317 : vector<32x1xf32>
      %319 = vector.broadcast %318 : vector<32x1xf32> to vector<32x32xf32>
      %320 = arith.mulf %315, %319 : vector<32x32xf32>
      %321 = vector.broadcast %301 : vector<1x32xf32> to vector<32x32xf32>
      %322 = arith.mulf %320, %321 : vector<32x32xf32>
      %323 = vector.broadcast %302 : vector<1x32xf32> to vector<32x32xf32>
      %324 = arith.addf %322, %323 : vector<32x32xf32>
      %c0_153 = arith.constant 0 : index
      %c0_154 = arith.constant 0 : index
      %325 = vector.load %arg20[%c0_153, %c0_154] : memref<32x32xf32, #tpu.memory_space<vmem>>, vector<32x32xf32>
      tpu.vector_store %arg20[%c0_153, %c0_154], %324 {strides = array<i32>} : memref<32x32xf32, #tpu.memory_space<vmem>>, vector<32x32xf32>,
    } else {
    }
    %c0 = arith.constant 0 : index
    %c0_1 = arith.constant 0 : index
    %3 = vector.load %arg20[%c0, %c0_1] : memref<32x32xf32, #tpu.memory_space<vmem>>, vector<32x32xf32>
    %4 = arith.truncf %3 : vector<32x32xf32> to vector<32x32xbf16>
    %c0_2 = arith.constant 0 : index
    %c0_3 = arith.constant 0 : index
    %c0_4 = arith.constant 0 : index
    %5 = vector.load %arg6[%c0_2, %c0_3, %c0_4] : memref<1x32x96xbf16, #tpu.memory_space<vmem>>, vector<1x32x96xbf16>
    %6 = vector.shape_cast %5 : vector<1x32x96xbf16> to vector<32x96xbf16>
    %cst = arith.constant dense<0.000000e+00> : vector<32x96xf32>
    %7 = tpu.matmul %4, %6, %cst {dimension_numbers = #tpu.dot_dimension_numbers<[1], [0], [0], [1], [0, 0, 1, 1], [], []>} : vector<32x32xbf16>, vector<32x96xbf16>, vector<32x96xf32> -> vector<32x96xf32>
    %c0_5 = arith.constant 0 : index
    %c0_6 = arith.constant 0 : index
    %c0_7 = arith.constant 0 : index
    %8 = vector.load %arg7[%c0_5, %c0_6, %c0_7] : memref<1x1x96xf32, #tpu.memory_space<vmem>>, vector<1x1x96xf32>
    %9 = vector.shape_cast %8 : vector<1x1x96xf32> to vector<1x96xf32>
    %10 = vector.broadcast %9 : vector<1x96xf32> to vector<32x96xf32>
    %11 = arith.addf %7, %10 : vector<32x96xf32>
    %12 = vector.extract_strided_slice %11 {offsets = [0, 0], sizes = [32, 32], strides = [1, 1]} : vector<32x96xf32> to vector<32x32xf32>
    %cst_8 = arith.constant 0.353553385 : f32
    %13 = vector.broadcast %cst_8 : f32 to vector<32x32xf32>
    %14 = arith.mulf %12, %13 : vector<32x32xf32>
    %15 = vector.extract_strided_slice %11 {offsets = [0, 32], sizes = [32, 32], strides = [1, 1]} : vector<32x96xf32> to vector<32x32xf32>
    %16 = vector.extract_strided_slice %11 {offsets = [0, 64], sizes = [32, 32], strides = [1, 1]} : vector<32x96xf32> to vector<32x32xf32>
    %17 = vector.extract_strided_slice %14 {offsets = [0, 0], sizes = [32, 8], strides = [1, 1]} : vector<32x32xf32> to vector<32x8xf32>
    %18 = vector.shape_cast %17 : vector<32x8xf32> to vector<2x16x8xf32>
    %19 = vector.extract_strided_slice %15 {offsets = [0, 0], sizes = [32, 8], strides = [1, 1]} : vector<32x32xf32> to vector<32x8xf32>
    %20 = vector.shape_cast %19 : vector<32x8xf32> to vector<2x16x8xf32>
    %21 = vector.extract_strided_slice %16 {offsets = [0, 0], sizes = [32, 8], strides = [1, 1]} : vector<32x32xf32> to vector<32x8xf32>
    %22 = vector.shape_cast %21 : vector<32x8xf32> to vector<2x16x8xf32>
    %23 = arith.truncf %18 : vector<2x16x8xf32> to vector<2x16x8xbf16>
    %24 = arith.truncf %20 : vector<2x16x8xf32> to vector<2x16x8xbf16>
    "tpu.trace_start"() <{level = 10 : i32, message = "bqd,bkd->bqk"}> : () -> ()
    %cst_9 = arith.constant dense<0.000000e+00> : vector<2x16x16xf32>
    %25 = tpu.matmul %23, %24, %cst_9 {dimension_numbers = #tpu.dot_dimension_numbers<[2], [2], [1], [1], [0, 0, 0, 1, 1, 1], [0], [0]>} : vector<2x16x8xbf16>, vector<2x16x8xbf16>, vector<2x16x16xf32> -> vector<2x16x16xf32>
    "tpu.trace_stop"() : () -> ()
    %cst_10 = arith.constant dense<0xFF800000> : vector<2x16xf32>
    %26 = vector.multi_reduction <maximumf>, %25, %cst_10 [2] : vector<2x16x16xf32> to vector<2x16xf32>
    %27 = vector.shape_cast %26 : vector<2x16xf32> to vector<2x16x1xf32>
    %28 = vector.broadcast %27 : vector<2x16x1xf32> to vector<2x16x16xf32>
    %29 = arith.subf %25, %28 : vector<2x16x16xf32>
    %30 = math.exp %29 : vector<2x16x16xf32>
    %cst_11 = arith.constant dense<0.000000e+00> : vector<2x16xf32>
    %31 = vector.multi_reduction <add>, %30, %cst_11 [2] : vector<2x16x16xf32> to vector<2x16xf32>
    %32 = vector.shape_cast %31 : vector<2x16xf32> to vector<2x16x1xf32>
    %33 = tpu.reciprocal %32 {approx = true} : vector<2x16x1xf32> -> vector<2x16x1xf32>
    %34 = vector.broadcast %33 : vector<2x16x1xf32> to vector<2x16x16xf32>
    %35 = arith.mulf %30, %34 : vector<2x16x16xf32>
    %36 = arith.truncf %35 : vector<2x16x16xf32> to vector<2x16x16xbf16>
    %37 = arith.truncf %22 : vector<2x16x8xf32> to vector<2x16x8xbf16>
    "tpu.trace_start"() <{level = 10 : i32, message = "bqk,bkd->bqd"}> : () -> ()
    %cst_12 = arith.constant dense<0.000000e+00> : vector<2x16x8xf32>
    %38 = tpu.matmul %36, %37, %cst_12 {dimension_numbers = #tpu.dot_dimension_numbers<[2], [1], [1], [2], [0, 0, 0, 1, 1, 2], [0], [0]>} : vector<2x16x16xbf16>, vector<2x16x8xbf16>, vector<2x16x8xf32> -> vector<2x16x8xf32>
    "tpu.trace_stop"() : () -> ()
    %39 = vector.shape_cast %38 : vector<2x16x8xf32> to vector<32x8xf32>
    %40 = vector.extract_strided_slice %14 {offsets = [0, 8], sizes = [32, 8], strides = [1, 1]} : vector<32x32xf32> to vector<32x8xf32>
    %41 = vector.shape_cast %40 : vector<32x8xf32> to vector<2x16x8xf32>
    %42 = vector.extract_strided_slice %15 {offsets = [0, 8], sizes = [32, 8], strides = [1, 1]} : vector<32x32xf32> to vector<32x8xf32>
    %43 = vector.shape_cast %42 : vector<32x8xf32> to vector<2x16x8xf32>
    %44 = vector.extract_strided_slice %16 {offsets = [0, 8], sizes = [32, 8], strides = [1, 1]} : vector<32x32xf32> to vector<32x8xf32>
    %45 = vector.shape_cast %44 : vector<32x8xf32> to vector<2x16x8xf32>
    %46 = arith.truncf %41 : vector<2x16x8xf32> to vector<2x16x8xbf16>
    %47 = arith.truncf %43 : vector<2x16x8xf32> to vector<2x16x8xbf16>
    "tpu.trace_start"() <{level = 10 : i32, message = "bqd,bkd->bqk"}> : () -> ()
    %cst_13 = arith.constant dense<0.000000e+00> : vector<2x16x16xf32>
    %48 = tpu.matmul %46, %47, %cst_13 {dimension_numbers = #tpu.dot_dimension_numbers<[2], [2], [1], [1], [0, 0, 0, 1, 1, 1], [0], [0]>} : vector<2x16x8xbf16>, vector<2x16x8xbf16>, vector<2x16x16xf32> -> vector<2x16x16xf32>
    "tpu.trace_stop"() : () -> ()
    %cst_14 = arith.constant dense<0xFF800000> : vector<2x16xf32>
    %49 = vector.multi_reduction <maximumf>, %48, %cst_14 [2] : vector<2x16x16xf32> to vector<2x16xf32>
    %50 = vector.shape_cast %49 : vector<2x16xf32> to vector<2x16x1xf32>
    %51 = vector.broadcast %50 : vector<2x16x1xf32> to vector<2x16x16xf32>
    %52 = arith.subf %48, %51 : vector<2x16x16xf32>
    %53 = math.exp %52 : vector<2x16x16xf32>
    %cst_15 = arith.constant dense<0.000000e+00> : vector<2x16xf32>
    %54 = vector.multi_reduction <add>, %53, %cst_15 [2] : vector<2x16x16xf32> to vector<2x16xf32>
    %55 = vector.shape_cast %54 : vector<2x16xf32> to vector<2x16x1xf32>
    %56 = tpu.reciprocal %55 {approx = true} : vector<2x16x1xf32> -> vector<2x16x1xf32>
    %57 = vector.broadcast %56 : vector<2x16x1xf32> to vector<2x16x16xf32>
    %58 = arith.mulf %53, %57 : vector<2x16x16xf32>
    %59 = arith.truncf %58 : vector<2x16x16xf32> to vector<2x16x16xbf16>
    %60 = arith.truncf %45 : vector<2x16x8xf32> to vector<2x16x8xbf16>
    "tpu.trace_start"() <{level = 10 : i32, message = "bqk,bkd->bqd"}> : () -> ()
    %cst_16 = arith.constant dense<0.000000e+00> : vector<2x16x8xf32>
    %61 = tpu.matmul %59, %60, %cst_16 {dimension_numbers = #tpu.dot_dimension_numbers<[2], [1], [1], [2], [0, 0, 0, 1, 1, 2], [0], [0]>} : vector<2x16x16xbf16>, vector<2x16x8xbf16>, vector<2x16x8xf32> -> vector<2x16x8xf32>
    "tpu.trace_stop"() : () -> ()
    %62 = vector.shape_cast %61 : vector<2x16x8xf32> to vector<32x8xf32>
    %63 = vector.extract_strided_slice %14 {offsets = [0, 16], sizes = [32, 8], strides = [1, 1]} : vector<32x32xf32> to vector<32x8xf32>
    %64 = vector.shape_cast %63 : vector<32x8xf32> to vector<2x16x8xf32>
    %65 = vector.extract_strided_slice %15 {offsets = [0, 16], sizes = [32, 8], strides = [1, 1]} : vector<32x32xf32> to vector<32x8xf32>
    %66 = vector.shape_cast %65 : vector<32x8xf32> to vector<2x16x8xf32>
    %67 = vector.extract_strided_slice %16 {offsets = [0, 16], sizes = [32, 8], strides = [1, 1]} : vector<32x32xf32> to vector<32x8xf32>
    %68 = vector.shape_cast %67 : vector<32x8xf32> to vector<2x16x8xf32>
    %69 = arith.truncf %64 : vector<2x16x8xf32> to vector<2x16x8xbf16>
    %70 = arith.truncf %66 : vector<2x16x8xf32> to vector<2x16x8xbf16>
    "tpu.trace_start"() <{level = 10 : i32, message = "bqd,bkd->bqk"}> : () -> ()
    %cst_17 = arith.constant dense<0.000000e+00> : vector<2x16x16xf32>
    %71 = tpu.matmul %69, %70, %cst_17 {dimension_numbers = #tpu.dot_dimension_numbers<[2], [2], [1], [1], [0, 0, 0, 1, 1, 1], [0], [0]>} : vector<2x16x8xbf16>, vector<2x16x8xbf16>, vector<2x16x16xf32> -> vector<2x16x16xf32>
    "tpu.trace_stop"() : () -> ()
    %cst_18 = arith.constant dense<0xFF800000> : vector<2x16xf32>
    %72 = vector.multi_reduction <maximumf>, %71, %cst_18 [2] : vector<2x16x16xf32> to vector<2x16xf32>
    %73 = vector.shape_cast %72 : vector<2x16xf32> to vector<2x16x1xf32>
    %74 = vector.broadcast %73 : vector<2x16x1xf32> to vector<2x16x16xf32>
    %75 = arith.subf %71, %74 : vector<2x16x16xf32>
    %76 = math.exp %75 : vector<2x16x16xf32>
    %cst_19 = arith.constant dense<0.000000e+00> : vector<2x16xf32>
    %77 = vector.multi_reduction <add>, %76, %cst_19 [2] : vector<2x16x16xf32> to vector<2x16xf32>
    %78 = vector.shape_cast %77 : vector<2x16xf32> to vector<2x16x1xf32>
    %79 = tpu.reciprocal %78 {approx = true} : vector<2x16x1xf32> -> vector<2x16x1xf32>
    %80 = vector.broadcast %79 : vector<2x16x1xf32> to vector<2x16x16xf32>
    %81 = arith.mulf %76, %80 : vector<2x16x16xf32>
    %82 = arith.truncf %81 : vector<2x16x16xf32> to vector<2x16x16xbf16>
    %83 = arith.truncf %68 : vector<2x16x8xf32> to vector<2x16x8xbf16>
    "tpu.trace_start"() <{level = 10 : i32, message = "bqk,bkd->bqd"}> : () -> ()
    %cst_20 = arith.constant dense<0.000000e+00> : vector<2x16x8xf32>
    %84 = tpu.matmul %82, %83, %cst_20 {dimension_numbers = #tpu.dot_dimension_numbers<[2], [1], [1], [2], [0, 0, 0, 1, 1, 2], [0], [0]>} : vector<2x16x16xbf16>, vector<2x16x8xbf16>, vector<2x16x8xf32> -> vector<2x16x8xf32>
    "tpu.trace_stop"() : () -> ()
    %85 = vector.shape_cast %84 : vector<2x16x8xf32> to vector<32x8xf32>
    %86 = vector.extract_strided_slice %14 {offsets = [0, 24], sizes = [32, 8], strides = [1, 1]} : vector<32x32xf32> to vector<32x8xf32>
    %87 = vector.shape_cast %86 : vector<32x8xf32> to vector<2x16x8xf32>
    %88 = vector.extract_strided_slice %15 {offsets = [0, 24], sizes = [32, 8], strides = [1, 1]} : vector<32x32xf32> to vector<32x8xf32>
    %89 = vector.shape_cast %88 : vector<32x8xf32> to vector<2x16x8xf32>
    %90 = vector.extract_strided_slice %16 {offsets = [0, 24], sizes = [32, 8], strides = [1, 1]} : vector<32x32xf32> to vector<32x8xf32>
    %91 = vector.shape_cast %90 : vector<32x8xf32> to vector<2x16x8xf32>
    %92 = arith.truncf %87 : vector<2x16x8xf32> to vector<2x16x8xbf16>
    %93 = arith.truncf %89 : vector<2x16x8xf32> to vector<2x16x8xbf16>
    "tpu.trace_start"() <{level = 10 : i32, message = "bqd,bkd->bqk"}> : () -> ()
    %cst_21 = arith.constant dense<0.000000e+00> : vector<2x16x16xf32>
    %94 = tpu.matmul %92, %93, %cst_21 {dimension_numbers = #tpu.dot_dimension_numbers<[2], [2], [1], [1], [0, 0, 0, 1, 1, 1], [0], [0]>} : vector<2x16x8xbf16>, vector<2x16x8xbf16>, vector<2x16x16xf32> -> vector<2x16x16xf32>
    "tpu.trace_stop"() : () -> ()
    %cst_22 = arith.constant dense<0xFF800000> : vector<2x16xf32>
    %95 = vector.multi_reduction <maximumf>, %94, %cst_22 [2] : vector<2x16x16xf32> to vector<2x16xf32>
    %96 = vector.shape_cast %95 : vector<2x16xf32> to vector<2x16x1xf32>
    %97 = vector.broadcast %96 : vector<2x16x1xf32> to vector<2x16x16xf32>
    %98 = arith.subf %94, %97 : vector<2x16x16xf32>
    %99 = math.exp %98 : vector<2x16x16xf32>
    %cst_23 = arith.constant dense<0.000000e+00> : vector<2x16xf32>
    %100 = vector.multi_reduction <add>, %99, %cst_23 [2] : vector<2x16x16xf32> to vector<2x16xf32>
    %101 = vector.shape_cast %100 : vector<2x16xf32> to vector<2x16x1xf32>
    %102 = tpu.reciprocal %101 {approx = true} : vector<2x16x1xf32> -> vector<2x16x1xf32>
    %103 = vector.broadcast %102 : vector<2x16x1xf32> to vector<2x16x16xf32>
    %104 = arith.mulf %99, %103 : vector<2x16x16xf32>
    %105 = arith.truncf %104 : vector<2x16x16xf32> to vector<2x16x16xbf16>
    %106 = arith.truncf %91 : vector<2x16x8xf32> to vector<2x16x8xbf16>
    "tpu.trace_start"() <{level = 10 : i32, message = "bqk,bkd->bqd"}> : () -> ()
    %cst_24 = arith.constant dense<0.000000e+00> : vector<2x16x8xf32>
    %107 = tpu.matmul %105, %106, %cst_24 {dimension_numbers = #tpu.dot_dimension_numbers<[2], [1], [1], [2], [0, 0, 0, 1, 1, 2], [0], [0]>} : vector<2x16x16xbf16>, vector<2x16x8xbf16>, vector<2x16x8xf32> -> vector<2x16x8xf32>
    "tpu.trace_stop"() : () -> ()
    %108 = vector.shape_cast %107 : vector<2x16x8xf32> to vector<32x8xf32>
    %109 = tpu.concatenate %39, %62, %85, %108 in 1 : vector<32x8xf32>, vector<32x8xf32>, vector<32x8xf32>, vector<32x8xf32> -> vector<32x32xf32>
    %110 = arith.truncf %109 : vector<32x32xf32> to vector<32x32xbf16>
    %c0_25 = arith.constant 0 : index
    %c0_26 = arith.constant 0 : index
    %c0_27 = arith.constant 0 : index
    %111 = vector.load %arg8[%c0_25, %c0_26, %c0_27] : memref<1x32x32xbf16, #tpu.memory_space<vmem>>, vector<1x32x32xbf16>
    %112 = vector.shape_cast %111 : vector<1x32x32xbf16> to vector<32x32xbf16>
    %cst_28 = arith.constant dense<0.000000e+00> : vector<32x32xf32>
    %113 = tpu.matmul %110, %112, %cst_28 {dimension_numbers = #tpu.dot_dimension_numbers<[1], [0], [0], [1], [0, 0, 1, 1], [], []>} : vector<32x32xbf16>, vector<32x32xbf16>, vector<32x32xf32> -> vector<32x32xf32>
    %c0_29 = arith.constant 0 : index
    %c0_30 = arith.constant 0 : index
    %c0_31 = arith.constant 0 : index
    %114 = vector.load %arg9[%c0_29, %c0_30, %c0_31] : memref<1x1x32xf32, #tpu.memory_space<vmem>>, vector<1x1x32xf32>
    %115 = vector.shape_cast %114 : vector<1x1x32xf32> to vector<1x32xf32>
    %116 = vector.broadcast %115 : vector<1x32xf32> to vector<32x32xf32>
    %117 = arith.addf %113, %116 : vector<32x32xf32>
    %118 = arith.addf %3, %117 : vector<32x32xf32>
    %c0_32 = arith.constant 0 : index
    %c0_33 = arith.constant 0 : index
    %c0_34 = arith.constant 0 : index
    %119 = vector.load %arg10[%c0_32, %c0_33, %c0_34] : memref<1x1x32xf32, #tpu.memory_space<vmem>>, vector<1x1x32xf32>
    %120 = vector.shape_cast %119 : vector<1x1x32xf32> to vector<1x32xf32>
    %c0_35 = arith.constant 0 : index
    %c0_36 = arith.constant 0 : index
    %c0_37 = arith.constant 0 : index
    %121 = vector.load %arg11[%c0_35, %c0_36, %c0_37] : memref<1x1x32xf32, #tpu.memory_space<vmem>>, vector<1x1x32xf32>
    %122 = vector.shape_cast %121 : vector<1x1x32xf32> to vector<1x32xf32>
    %cst_38 = arith.constant dense<0.000000e+00> : vector<32xf32>
    %123 = vector.multi_reduction <add>, %118, %cst_38 [1] : vector<32x32xf32> to vector<32xf32>
    %124 = vector.shape_cast %123 : vector<32xf32> to vector<32x1xf32>
    %cst_39 = arith.constant 3.200000e+01 : f32
    %125 = vector.broadcast %cst_39 : f32 to vector<32x1xf32>
    %126 = arith.divf %124, %125 : vector<32x1xf32>
    %127 = vector.broadcast %126 : vector<32x1xf32> to vector<32x32xf32>
    %128 = arith.subf %118, %127 : vector<32x32xf32>
    %129 = arith.mulf %128, %128 : vector<32x32xf32>
    %cst_40 = arith.constant dense<0.000000e+00> : vector<32xf32>
    %130 = vector.multi_reduction <add>, %129, %cst_40 [1] : vector<32x32xf32> to vector<32xf32>
    %131 = vector.shape_cast %130 : vector<32xf32> to vector<32x1xf32>
    %cst_41 = arith.constant 3.200000e+01 : f32
    %132 = vector.broadcast %cst_41 : f32 to vector<32x1xf32>
    %133 = arith.divf %131, %132 : vector<32x1xf32>
    %134 = vector.broadcast %126 : vector<32x1xf32> to vector<32x32xf32>
    %135 = arith.subf %118, %134 : vector<32x32xf32>
    %cst_42 = arith.constant 9.99999974E-6 : f32
    %136 = vector.broadcast %cst_42 : f32 to vector<32x1xf32>
    %137 = arith.addf %133, %136 : vector<32x1xf32>
    %138 = math.rsqrt %137 : vector<32x1xf32>
    %139 = vector.broadcast %138 : vector<32x1xf32> to vector<32x32xf32>
    %140 = arith.mulf %135, %139 : vector<32x32xf32>
    %141 = vector.broadcast %120 : vector<1x32xf32> to vector<32x32xf32>
    %142 = arith.mulf %140, %141 : vector<32x32xf32>
    %143 = vector.broadcast %122 : vector<1x32xf32> to vector<32x32xf32>
    %144 = arith.addf %142, %143 : vector<32x32xf32>
    %145 = arith.truncf %144 : vector<32x32xf32> to vector<32x32xbf16>
    %c0_43 = arith.constant 0 : index
    %c0_44 = arith.constant 0 : index
    %c0_45 = arith.constant 0 : index
    %146 = vector.load %arg12[%c0_43, %c0_44, %c0_45] : memref<1x32x64xbf16, #tpu.memory_space<vmem>>, vector<1x32x64xbf16>
    %147 = vector.shape_cast %146 : vector<1x32x64xbf16> to vector<32x64xbf16>
    %cst_46 = arith.constant dense<0.000000e+00> : vector<32x64xf32>
    %148 = tpu.matmul %145, %147, %cst_46 {dimension_numbers = #tpu.dot_dimension_numbers<[1], [0], [0], [1], [0, 0, 1, 1], [], []>} : vector<32x32xbf16>, vector<32x64xbf16>, vector<32x64xf32> -> vector<32x64xf32>
    %c0_47 = arith.constant 0 : index
    %c0_48 = arith.constant 0 : index
    %c0_49 = arith.constant 0 : index
    %149 = vector.load %arg13[%c0_47, %c0_48, %c0_49] : memref<1x1x64xf32, #tpu.memory_space<vmem>>, vector<1x1x64xf32>
    %150 = vector.shape_cast %149 : vector<1x1x64xf32> to vector<1x64xf32>
    %151 = vector.broadcast %150 : vector<1x64xf32> to vector<32x64xf32>
    %152 = arith.addf %148, %151 : vector<32x64xf32>
    %cst_50 = arith.constant 0.000000e+00 : f32
    %153 = vector.broadcast %cst_50 : f32 to vector<32x64xf32>
    %154 = arith.maximumf %152, %153 : vector<32x64xf32>
    %155 = arith.truncf %154 : vector<32x64xf32> to vector<32x64xbf16>
    %c0_51 = arith.constant 0 : index
    %c0_52 = arith.constant 0 : index
    %c0_53 = arith.constant 0 : index
    %156 = vector.load %arg14[%c0_51, %c0_52, %c0_53] : memref<1x64x32xbf16, #tpu.memory_space<vmem>>, vector<1x64x32xbf16>
    %157 = vector.shape_cast %156 : vector<1x64x32xbf16> to vector<64x32xbf16>
    %cst_54 = arith.constant dense<0.000000e+00> : vector<32x32xf32>
    %158 = tpu.matmul %155, %157, %cst_54 {dimension_numbers = #tpu.dot_dimension_numbers<[1], [0], [0], [1], [0, 0, 1, 1], [], []>} : vector<32x64xbf16>, vector<64x32xbf16>, vector<32x32xf32> -> vector<32x32xf32>
    %c0_55 = arith.constant 0 : index
    %c0_56 = arith.constant 0 : index
    %c0_57 = arith.constant 0 : index
    %159 = vector.load %arg15[%c0_55, %c0_56, %c0_57] : memref<1x1x32xf32, #tpu.memory_space<vmem>>, vector<1x1x32xf32>
    %160 = vector.shape_cast %159 : vector<1x1x32xf32> to vector<1x32xf32>
    %161 = vector.broadcast %160 : vector<1x32xf32> to vector<32x32xf32>
    %162 = arith.addf %158, %161 : vector<32x32xf32>
    %163 = arith.addf %144, %162 : vector<32x32xf32>
    %c0_58 = arith.constant 0 : index
    %c0_59 = arith.constant 0 : index
    %c0_60 = arith.constant 0 : index
    %164 = vector.load %arg16[%c0_58, %c0_59, %c0_60] : memref<1x1x32xf32, #tpu.memory_space<vmem>>, vector<1x1x32xf32>
    %165 = vector.shape_cast %164 : vector<1x1x32xf32> to vector<1x32xf32>
    %c0_61 = arith.constant 0 : index
    %c0_62 = arith.constant 0 : index
    %c0_63 = arith.constant 0 : index
    %166 = vector.load %arg17[%c0_61, %c0_62, %c0_63] : memref<1x1x32xf32, #tpu.memory_space<vmem>>, vector<1x1x32xf32>
    %167 = vector.shape_cast %166 : vector<1x1x32xf32> to vector<1x32xf32>
    %cst_64 = arith.constant dense<0.000000e+00> : vector<32xf32>
    %168 = vector.multi_reduction <add>, %163, %cst_64 [1] : vector<32x32xf32> to vector<32xf32>
    %169 = vector.shape_cast %168 : vector<32xf32> to vector<32x1xf32>
    %cst_65 = arith.constant 3.200000e+01 : f32
    %170 = vector.broadcast %cst_65 : f32 to vector<32x1xf32>
    %171 = arith.divf %169, %170 : vector<32x1xf32>
    %172 = vector.broadcast %171 : vector<32x1xf32> to vector<32x32xf32>
    %173 = arith.subf %163, %172 : vector<32x32xf32>
    %174 = arith.mulf %173, %173 : vector<32x32xf32>
    %cst_66 = arith.constant dense<0.000000e+00> : vector<32xf32>
    %175 = vector.multi_reduction <add>, %174, %cst_66 [1] : vector<32x32xf32> to vector<32xf32>
    %176 = vector.shape_cast %175 : vector<32xf32> to vector<32x1xf32>
    %cst_67 = arith.constant 3.200000e+01 : f32
    %177 = vector.broadcast %cst_67 : f32 to vector<32x1xf32>
    %178 = arith.divf %176, %177 : vector<32x1xf32>
    %179 = vector.broadcast %171 : vector<32x1xf32> to vector<32x32xf32>
    %180 = arith.subf %163, %179 : vector<32x32xf32>
    %cst_68 = arith.constant 9.99999974E-6 : f32
    %181 = vector.broadcast %cst_68 : f32 to vector<32x1xf32>
    %182 = arith.addf %178, %181 : vector<32x1xf32>
    %183 = math.rsqrt %182 : vector<32x1xf32>
    %184 = vector.broadcast %183 : vector<32x1xf32> to vector<32x32xf32>
    %185 = arith.mulf %180, %184 : vector<32x32xf32>
    %186 = vector.broadcast %165 : vector<1x32xf32> to vector<32x32xf32>
    %187 = arith.mulf %185, %186 : vector<32x32xf32>
    %188 = vector.broadcast %167 : vector<1x32xf32> to vector<32x32xf32>
    %189 = arith.addf %187, %188 : vector<32x32xf32>
    %c0_69 = arith.constant 0 : index
    %c0_70 = arith.constant 0 : index
    %190 = vector.load %arg20[%c0_69, %c0_70] : memref<32x32xf32, #tpu.memory_space<vmem>>, vector<32x32xf32>
    tpu.vector_store %arg20[%c0_69, %c0_70], %189 {strides = array<i32>} : memref<32x32xf32, #tpu.memory_space<vmem>>, vector<32x32xf32>,
    %c1_i32 = arith.constant 1 : i32
    %191 = arith.cmpi eq, %arg0, %c1_i32 : i32
    %192 = arith.extui %191 : i1 to i32
    %c0_i32_71 = arith.constant 0 : i32
    %193 = arith.cmpi ne, %192, %c0_i32_71 : i32
    scf.if %193 {
      %197 = vector.extract_strided_slice %189 {offsets = [0, 0], sizes = [8, 32], strides = [1, 1]} : vector<32x32xf32> to vector<8x32xf32>
      %198 = vector.extract_strided_slice %189 {offsets = [8, 0], sizes = [8, 32], strides = [1, 1]} : vector<32x32xf32> to vector<8x32xf32>
      %199 = vector.extract_strided_slice %189 {offsets = [16, 0], sizes = [8, 32], strides = [1, 1]} : vector<32x32xf32> to vector<8x32xf32>
      %200 = vector.extract_strided_slice %189 {offsets = [24, 0], sizes = [8, 32], strides = [1, 1]} : vector<32x32xf32> to vector<8x32xf32>
      %201 = tpu.concatenate %197, %198, %199, %200 in 1 : vector<8x32xf32>, vector<8x32xf32>, vector<8x32xf32>, vector<8x32xf32> -> vector<8x128xf32>
      %c0_73 = arith.constant 0 : index
      %c0_74 = arith.constant 0 : index
      %202 = vector.load %arg19[%c0_73, %c0_74] : memref<8x128xf32, #tpu.memory_space<vmem>>, vector<8x128xf32>
      tpu.vector_store %arg19[%c0_73, %c0_74], %201 {strides = array<i32>} : memref<8x128xf32, #tpu.memory_space<vmem>>, vector<8x128xf32>,
    } else {
    }
    %c2_i32 = arith.constant 2 : i32
    %194 = arith.cmpi eq, %arg0, %c2_i32 : i32
    %195 = arith.extui %194 : i1 to i32
    %c0_i32_72 = arith.constant 0 : i32
    %196 = arith.cmpi ne, %195, %c0_i32_72 : i32
    scf.if %196 {
      %197 = vector.extract_strided_slice %189 {offsets = [0, 0], sizes = [8, 32], strides = [1, 1]} : vector<32x32xf32> to vector<8x32xf32>
      %198 = vector.extract_strided_slice %189 {offsets = [8, 0], sizes = [8, 32], strides = [1, 1]} : vector<32x32xf32> to vector<8x32xf32>
      %199 = vector.extract_strided_slice %189 {offsets = [16, 0], sizes = [8, 32], strides = [1, 1]} : vector<32x32xf32> to vector<8x32xf32>
      %200 = vector.extract_strided_slice %189 {offsets = [24, 0], sizes = [8, 32], strides = [1, 1]} : vector<32x32xf32> to vector<8x32xf32>
      %201 = tpu.concatenate %197, %198, %199, %200 in 1 : vector<8x32xf32>, vector<8x32xf32>, vector<8x32xf32>, vector<8x32xf32> -> vector<8x128xf32>
      %c0_73 = arith.constant 0 : index
      %c0_74 = arith.constant 0 : index
      %202 = vector.load %arg18[%c0_73, %c0_74] : memref<8x128xf32, #tpu.memory_space<vmem>>, vector<8x128xf32>
      tpu.vector_store %arg18[%c0_73, %c0_74], %201 {strides = array<i32>} : memref<8x128xf32, #tpu.memory_space<vmem>>, vector<8x128xf32>,
    } else {
    }
    return
  }
  func.func @transform_0(%arg0: i32) -> (i32, i32, i32) {
    %c0_i32 = arith.constant 0 : i32
    %c0_i32_0 = arith.constant 0 : i32
    %c0_i32_1 = arith.constant 0 : i32
    %c0_i32_2 = arith.constant 0 : i32
    return %c0_i32, %c0_i32_0, %c0_i32_1 : i32, i32, i32
  }
  func.func @transform_1(%arg0: i32) -> (i32, i32, i32) {
    %c0_i32 = arith.constant 0 : i32
    %c0_i32_0 = arith.constant 0 : i32
    %c0_i32_1 = arith.constant 0 : i32
    %c0_i32_2 = arith.constant 0 : i32
    return %c0_i32, %c0_i32_0, %c0_i32_1 : i32, i32, i32
  }
  func.func @transform_2(%arg0: i32) -> (i32, i32) {
    %c0_i32 = arith.constant 0 : i32
    %c0_i32_0 = arith.constant 0 : i32
    %c0_i32_1 = arith.constant 0 : i32
    return %c0_i32, %c0_i32_0 : i32, i32
  }
  func.func @transform_3(%arg0: i32) -> (i32, i32) {
    %c0_i32 = arith.constant 0 : i32
    %c0_i32_0 = arith.constant 0 : i32
    %c0_i32_1 = arith.constant 0 : i32
    return %c0_i32, %c0_i32_0 : i32, i32
  }
  func.func @transform_4(%arg0: i32) -> (i32, i32) {
    %c0_i32 = arith.constant 0 : i32
    %c0_i32_0 = arith.constant 0 : i32
    %c0_i32_1 = arith.constant 0 : i32
    return %c0_i32, %c0_i32_0 : i32, i32
  }
  func.func @transform_5(%arg0: i32) -> (i32, i32, i32) {
    %c0_i32 = arith.constant 0 : i32
    %c0_i32_0 = arith.constant 0 : i32
    %c0_i32_1 = arith.constant 0 : i32
    return %arg0, %c0_i32, %c0_i32_0 : i32, i32, i32
  }
  func.func @transform_6(%arg0: i32) -> (i32, i32, i32) {
    %c0_i32 = arith.constant 0 : i32
    %c0_i32_0 = arith.constant 0 : i32
    %c0_i32_1 = arith.constant 0 : i32
    return %arg0, %c0_i32, %c0_i32_0 : i32, i32, i32
  }
  func.func @transform_7(%arg0: i32) -> (i32, i32, i32) {
    %c0_i32 = arith.constant 0 : i32
    %c0_i32_0 = arith.constant 0 : i32
    %c0_i32_1 = arith.constant 0 : i32
    return %arg0, %c0_i32, %c0_i32_0 : i32, i32, i32
  }
  func.func @transform_8(%arg0: i32) -> (i32, i32, i32) {
    %c0_i32 = arith.constant 0 : i32
    %c0_i32_0 = arith.constant 0 : i32
    %c0_i32_1 = arith.constant 0 : i32
    return %arg0, %c0_i32, %c0_i32_0 : i32, i32, i32
  }
  func.func @transform_9(%arg0: i32) -> (i32, i32, i32) {
    %c0_i32 = arith.constant 0 : i32
    %c0_i32_0 = arith.constant 0 : i32
    %c0_i32_1 = arith.constant 0 : i32
    return %arg0, %c0_i32, %c0_i32_0 : i32, i32, i32
  }
  func.func @transform_10(%arg0: i32) -> (i32, i32, i32) {
    %c0_i32 = arith.constant 0 : i32
    %c0_i32_0 = arith.constant 0 : i32
    %c0_i32_1 = arith.constant 0 : i32
    return %arg0, %c0_i32, %c0_i32_0 : i32, i32, i32
  }
  func.func @transform_11(%arg0: i32) -> (i32, i32, i32) {
    %c0_i32 = arith.constant 0 : i32
    %c0_i32_0 = arith.constant 0 : i32
    %c0_i32_1 = arith.constant 0 : i32
    return %arg0, %c0_i32, %c0_i32_0 : i32, i32, i32
  }
  func.func @transform_12(%arg0: i32) -> (i32, i32, i32) {
    %c0_i32 = arith.constant 0 : i32
    %c0_i32_0 = arith.constant 0 : i32
    %c0_i32_1 = arith.constant 0 : i32
    return %arg0, %c0_i32, %c0_i32_0 : i32, i32, i32
  }
  func.func @transform_13(%arg0: i32) -> (i32, i32, i32) {
    %c0_i32 = arith.constant 0 : i32
    %c0_i32_0 = arith.constant 0 : i32
    %c0_i32_1 = arith.constant 0 : i32
    return %arg0, %c0_i32, %c0_i32_0 : i32, i32, i32
  }
  func.func @transform_14(%arg0: i32) -> (i32, i32, i32) {
    %c0_i32 = arith.constant 0 : i32
    %c0_i32_0 = arith.constant 0 : i32
    %c0_i32_1 = arith.constant 0 : i32
    return %arg0, %c0_i32, %c0_i32_0 : i32, i32, i32
  }
  func.func @transform_15(%arg0: i32) -> (i32, i32, i32) {
    %c0_i32 = arith.constant 0 : i32
    %c0_i32_0 = arith.constant 0 : i32
    %c0_i32_1 = arith.constant 0 : i32
    return %arg0, %c0_i32, %c0_i32_0 : i32, i32, i32
  }
  func.func @transform_16(%arg0: i32) -> (i32, i32, i32) {
    %c0_i32 = arith.constant 0 : i32
    %c0_i32_0 = arith.constant 0 : i32
    %c0_i32_1 = arith.constant 0 : i32
    return %arg0, %c0_i32, %c0_i32_0 : i32, i32, i32
  }
  func.func @transform_17(%arg0: i32) -> (i32, i32) {
    %c0_i32 = arith.constant 0 : i32
    %c0_i32_0 = arith.constant 0 : i32
    %c0_i32_1 = arith.constant 0 : i32
    return %c0_i32, %c0_i32_0 : i32, i32
  }
  func.func @transform_18(%arg0: i32) -> (i32, i32) {
    %c0_i32 = arith.constant 0 : i32
    %c0_i32_0 = arith.constant 0 : i32
    %c0_i32_1 = arith.constant 0 : i32
    return %c0_i32, %c0_i32_0 : i32, i32
  }
}

</mosaic_0001>

<bundles_post_ra>
// kernel: transformer_encoder_forward.1
= control target key start
LH: loop header
LB: loop body
LE: loop exit
PB: predicated region body
PF: predicated region fallthrough
CT: control target
= control target key end

     0   :  { %s4041_s27 = smov 0   ;;  %s4610_s0 = inlined_call_operand.vmem [shape: f32[2,24,32], index: 0, kind: input, shape index: {}]   ;;  %s4611_s1 = inlined_call_operand.vmem [shape: bf16[8,32,32], index: 1, kind: input, shape index: {}]   ;;  %s4612_s2 = inlined_call_operand.vmem [shape: f32[1,32], index: 2, kind: input, shape index: {}]   ;;  %s4613_s3 = inlined_call_operand.vmem [shape: f32[1,32], index: 3, kind: input, shape index: {}]   ;;  %s4614_s4 = inlined_call_operand.vmem [shape: f32[1,32], index: 4, kind: input, shape index: {}]   ;;  %s4615_s5 = inlined_call_operand.vmem [shape: bf16[3,32,96], index: 5, kind: input, shape index: {}]   ;;  %s4616_s6 = inlined_call_operand.vmem [shape: f32[3,1,96], index: 6, kind: input, shape index: {}]   ;;  %s4617_s7 = inlined_call_operand.vmem [shape: bf16[3,32,32], index: 7, kind: input, shape index: {}]   ;;  %s4618_s8 = inlined_call_operand.vmem [shape: f32[3,1,32], index: 8, kind: input, shape index: {}]   ;;  %s4619_s9 = inlined_call_operand.vmem [shape: f32[3,1,32], index: 9, kind: input, shape index: {}]   ;;  %s4620_s10 = inlined_call_operand.vmem [shape: f32[3,1,32], index: 10, kind: input, shape index: {}]   ;;  %s4621_s11 = inlined_call_operand.vmem [shape: bf16[3,32,64], index: 11, kind: input, shape index: {}]   ;;  %s4622_s12 = inlined_call_operand.vmem [shape: f32[3,1,64], index: 12, kind: input, shape index: {}]   ;;  %s4623_s13 = inlined_call_operand.vmem [shape: bf16[3,64,32], index: 13, kind: input, shape index: {}]   ;;  %s4624_s14 = inlined_call_operand.vmem [shape: f32[3,1,32], index: 14, kind: input, shape index: {}]   ;;  %s4625_s15 = inlined_call_operand.vmem [shape: f32[3,1,32], index: 15, kind: input, shape index: {}]   ;;  %s4626_s16 = inlined_call_operand.vmem [shape: f32[3,1,32], index: 16, kind: input, shape index: {}]   ;;  %s4627_s17 = inlined_call_operand.vmem [shape: f32[8,128], index: 17, kind: output, shape index: {0}]   ;;  %s4628_s18 = inlined_call_operand.vmem [shape: f32[8,128], index: 18, kind: output, shape index: {1}]  }
   0x1   :  { %4633 = sst [smem:[#allocation5_spill]] %s4610_s0 }
   0x2   :  { %4634 = sst [smem:[#allocation6_spill]] %s4611_s1 }
   0x3   :  { %4635 = sst [smem:[#allocation7_spill]] %s4612_s2 }
   0x4   :  { %4636 = sst [smem:[#allocation8_spill]] %s4614_s4 }
   0x5   :  { %4637 = sst [smem:[#allocation9_spill]] %s4615_s5 }
   0x6   :  { %4638 = sst [smem:[#allocation10_spill]] %s4617_s7 }
   0x7   :  { %4639 = sst [smem:[#allocation11_spill]] %s4627_s17 }
   0x8   :  { %4640 = sst [smem:[#allocation12_spill]] %s4628_s18 }
   0x9 LB: > { %4641 = sst [smem:[#allocation3_spill]] %s3921_s27  ;;  %s4047_s28 = sadd.s32 4294967295, %s3921_s27   ;;  %s3921_s27 = sphi %s4041_s27, %s29_s27  }
   0xa   : > { %p3319_p0 = scmp.ge.s32.totalorder %s3921_s27, 1  ;;  %p599_p1 = scmp.lt.s32.totalorder %s3921_s27, 4 }
   0xc   : > { %p600_p2 = pnand %p3319_p0, %p599_p1 }
   0xe   : > { %603 = sbr.rel (%p600_p2) target bundleno = 4883 (0x1313), region = 88 }
  0x13   : > { %p687_p3 = scmp.lt.s32.totalorder %s4047_s28, 2  ;;  %s4642_s5 = sld [smem:[#allocation9_spill]] }
  0x14   : > { %s4643_s7 = sld [smem:[#allocation10_spill]]  ;;  %p3328_p4 = scmp.ne.s32.totalorder %s4047_s28, 0 }
  0x15   : > { %s4053_s29 = scalar_select %p687_p3, %s4047_s28, 2 }
  0x16   : > { %s4645_s25 = sld [smem:[#allocation6_spill]] (!%p3328_p4) }
  0x17   : > { %s3438_s30 = sshll.u32 %s4053_s29, 4  ;;  %s724_s0 = scalar_lea.vmem %s4624_s14, %s4053_s29 }
  0x18   : > { %s727_s20 = scalar_lea.vmem %s4625_s15, %s4053_s29  ;;  %735 = sbr.rel (%p3328_p4) target bundleno = 634 (0x27a), region = 92 }
  0x19   : > { %s4063_s22 = scalar_lea.vmem %s4642_s5, %s3438_s30  ;;  %s4085_s5 = scalar_lea.vmem %s4621_s11, %s3438_s30 }
  0x1a   : > { %s4068_s24 = scalar_lea.vmem %s4643_s7, %s3438_s30  ;;  %s716_s7 = scalar_lea.vmem %s4622_s12, %s4053_s29 }
  0x1b   : > { %4644 = sst [smem:[#allocation4_spill]] %s4068_s24  ;;  %s3441_s24 = sshll.u32 %s4053_s29, 5 }
  0x1c   : > { %s4095_s27 = scalar_lea.vmem %s4623_s13, %s3441_s24  ;;  %s4646_s2 = sld [smem:[#allocation5_spill]] (!%p3328_p4) }
  0x1d   : > { %v3751_v0 = vld [vmem:[%s4645_s25 + $0x18] sm:$0xff]   ;;  %v3752_v1 = vld [vmem:[%s4645_s25 + $0x8] sm:$0xff]   ;;  %v3753_v2 = vld [vmem:[%s4645_s25 + $0x10] sm:$0xff]   ;;  %vm769_vm0 = vcmask 261120   ;;  %s4647_s30 = sld [smem:[#allocation7_spill]] }
  0x1e   : > { %3524 = vmatprep.subr.bf16.mxu0 %v3751_v0  ;;  %3532 = vmatprep.subr.bf16.mxu1 %v3752_v1  ;;  %v3754_v3 = vld [vmem:[%s4645_s25] sm:$0xff]   ;;  %v3755_v16 = vld [vmem:[%s4645_s25 + $0x28] sm:$0xff]   ;;  %v3756_v17 = vld [vmem:[%s4645_s25 + $0x38] sm:$0xff]   ;;  %s4648_s17 = sld [smem:[#allocation8_spill]] }
  0x1f   : > { %3525 = vmatpush3.bf16.msra.mxu0 %v3751_v0  ;;  %3533 = vmatpush3.bf16.msra.mxu1 %v3752_v1  ;;  %v3757_v18 = vld [vmem:[%s4645_s25 + $0x20] sm:$0xff]   ;;  %v3758_v19 = vld [vmem:[%s4645_s25 + $0x30] sm:$0xff]   ;;  %v3759_v31 = vld [vmem:[%s4645_s25 + $0x48] sm:$0xff]  }
  0x20   : > { %3526 = vmatprep.subr.bf16.mxu0 %v3753_v2  ;;  %3534 = vmatprep.subr.bf16.mxu1 %v3754_v3  ;;  %v3760_v33 = vld [vmem:[%s4645_s25 + $0x58] sm:$0xff]   ;;  %v3761_v34 = vld [vmem:[%s4645_s25 + $0x40] sm:$0xff]   ;;  %v3762_v35 = vld [vmem:[%s4645_s25 + $0x50] sm:$0xff]  }
  0x21   : > { %v3763_v46 = vld [vmem:[%s4645_s25 + $0x68] sm:$0xff]   ;;  %v3764_v47 = vld [vmem:[%s4645_s25 + $0x78] sm:$0xff]   ;;  %v3765_v50 = vld [vmem:[%s4645_s25 + $0x60] sm:$0xff]  }
  0x22   : > { %v746_v4 = vld [vmem:[%s4646_s2 + $0x1] sm:$0xff]  ;;  %v747_v5 = vld [vmem:[%s4646_s2 + $0x9] sm:$0xff]  ;;  %v748_v9 = vld [vmem:[%s4646_s2 + $0x19] sm:$0xff] }
  0x23   : > { %v736_v6 = vld [vmem:[%s4646_s2] sm:$0xff]  ;;  %v750_v7 = vpack.c.bf16 %v747_v5, %v746_v4  ;;  %v737_v8 = vld [vmem:[%s4646_s2 + $0x8] sm:$0xff]  ;;  %v738_v13 = vld [vmem:[%s4646_s2 + $0x18] sm:$0xff]  ;;  %3527 = vmatpush3.bf16.msra.mxu0 %v3753_v2  ;;  %3535 = vmatpush3.bf16.msra.mxu1 %v3754_v3 }
  0x24   : > { %v749_v10 = vld [vmem:[%s4646_s2 + $0x21] sm:$0xff]  ;;  %v740_v11 = vpack.c.bf16 %v737_v8, %v736_v6  ;;  %3540 = vmatprep.subr.bf16.mxu0 %v3755_v16  ;;  %3548 = vmatprep.subr.bf16.mxu1 %v3756_v17  ;;  %v893_v21 = vld [vmem:[%s4646_s2 + $0xa] sm:$0xff] }
  0x25   : > { %v751_v12 = vpack.c.bf16 %v749_v10, %v748_v9  ;;  %v739_v14 = vld [vmem:[%s4646_s2 + $0x20] sm:$0xff]  ;;  %3528 = vmatprep.mubr.msk.bf16.mxu0 %vm769_vm0, %v750_v7  ;;  %v975_v23 = vld [vmem:[%s4646_s2 + $0xb] sm:$0xff] }
  0x26   : > { %v741_v15 = vpack.c.bf16 %v739_v14, %v738_v13  ;;  %3536 = vmatprep.mubr.msk.bf16.mxu1 %vm769_vm0, %v740_v11  ;;  %v892_v20 = vld [vmem:[%s4646_s2 + $0x2] sm:$0xff]  ;;  %v894_v26 = vld [vmem:[%s4646_s2 + $0x1a] sm:$0xff]  ;;  %v4208_v37 = vld [vmem:[%s4646_s2 + $0xc] sm:$0xff] }
  0x27   : > { %3529 = vmatmul.mubr.msk.bf16.vlgmr.msra.gmra.mxu0 %vm769_vm0, %v751_v12  ;;  %v974_v22 = vld [vmem:[%s4646_s2 + $0x3] sm:$0xff]  ;;  %v896_v24 = vpack.c.bf16 %v893_v21, %v892_v20  ;;  %v976_v28 = vld [vmem:[%s4646_s2 + $0x1b] sm:$0xff]  ;;  %v1139_v40 = vld [vmem:[%s4646_s2 + $0xd] sm:$0xff] }
  0x28   : > { %3537 = vmatmul.mubr.msk.bf16.vlgmr.msra.gmra.mxu1 %vm769_vm0, %v741_v15  ;;  %3541 = vmatpush3.bf16.msra.mxu0 %v3755_v16  ;;  %v978_v25 = vpack.c.bf16 %v975_v23, %v974_v22  ;;  %v895_v27 = vld [vmem:[%s4646_s2 + $0x22] sm:$0xff]  ;;  %v1221_v52 = vld [vmem:[%s4646_s2 + $0xe] sm:$0xff] }
  0x29   : > { %3549 = vmatpush3.bf16.msra.mxu1 %v3756_v17  ;;  %3542 = vmatprep.subr.bf16.mxu0 %v3757_v18  ;;  %v977_v29 = vld [vmem:[%s4646_s2 + $0x23] sm:$0xff]  ;;  %v897_v30 = vpack.c.bf16 %v895_v27, %v894_v26  ;;  %v3766_v54 = vld [vmem:[%s4645_s25 + $0x70] sm:$0xff]  }
  0x2a   : > { %3550 = vmatprep.subr.bf16.mxu1 %v3758_v19  ;;  %3544 = vmatprep.mubr.msk.bf16.mxu0 %vm769_vm0, %v896_v24  ;;  %v979_v32 = vpack.c.bf16 %v977_v29, %v976_v28  ;;  %v4203_v36 = vld [vmem:[%s4646_s2 + $0x4] sm:$0xff]  ;;  %v4222_v41 = vld [vmem:[%s4646_s2 + $0x1c] sm:$0xff]  ;;  %v1303_v56 = vld [vmem:[%s4646_s2 + $0xf] sm:$0xff] }
  0x2b   : > { %3552 = vmatprep.mubr.msk.bf16.mxu1 %vm769_vm0, %v978_v25  ;;  %v1060_v38 = vpack.c.bf16 %v4208_v37, %v4203_v36  ;;  %v1138_v39 = vld [vmem:[%s4646_s2 + $0x5] sm:$0xff]  ;;  %v1140_v44 = vld [vmem:[%s4646_s2 + $0x1d] sm:$0xff] }
  0x2c   : > { %3543 = vmatpush3.bf16.msra.mxu0 %v3757_v18  ;;  %v1142_v42 = vpack.c.bf16 %v1139_v40, %v1138_v39  ;;  %v4228_v43 = vld [vmem:[%s4646_s2 + $0x24] sm:$0xff] }
  0x2d   : > { %3551 = vmatpush3.bf16.msra.mxu1 %v3758_v19  ;;  %3556 = vmatprep.subr.bf16.mxu0 %v3759_v31  ;;  %v1141_v45 = vld [vmem:[%s4646_s2 + $0x25] sm:$0xff]  ;;  %v1061_v48 = vpack.c.bf16 %v4228_v43, %v4222_v41 }
  0x2e   : > { %3564 = vmatprep.subr.bf16.mxu1 %v3760_v33  ;;  %v1143_v49 = vpack.c.bf16 %v1141_v45, %v1140_v44  ;;  %v1220_v51 = vld [vmem:[%s4646_s2 + $0x6] sm:$0xff]  ;;  %v1222_v58 = vld [vmem:[%s4646_s2 + $0x1e] sm:$0xff] }
  0x2f   : > { %3545 = vmatmul.mubr.msk.bf16.vlgmr.msra.gmra.mxu0 %vm769_vm0, %v897_v30  ;;  %v1302_v53 = vld [vmem:[%s4646_s2 + $0x7] sm:$0xff]  ;;  %v1224_v55 = vpack.c.bf16 %v1221_v52, %v1220_v51  ;;  %v1304_v60 = vld [vmem:[%s4646_s2 + $0x1f] sm:$0xff] }
  0x30   : > { %3553 = vmatmul.mubr.msk.bf16.vlgmr.msra.gmra.mxu1 %vm769_vm0, %v979_v32  ;;  %3557 = vmatpush3.bf16.msra.mxu0 %v3759_v31  ;;  %v1306_v57 = vpack.c.bf16 %v1303_v56, %v1302_v53  ;;  %v1223_v59 = vld [vmem:[%s4646_s2 + $0x26] sm:$0xff] }
  0x31   : > { %3565 = vmatpush3.bf16.msra.mxu1 %v3760_v33  ;;  %3558 = vmatprep.subr.bf16.mxu0 %v3761_v34  ;;  %v1305_v61 = vld [vmem:[%s4646_s2 + $0x27] sm:$0xff]  ;;  %v1225_v62 = vpack.c.bf16 %v1223_v59, %v1222_v58 }
  0x32   : > { %3566 = vmatprep.subr.bf16.mxu1 %v3762_v35  ;;  %3560 = vmatprep.mubr.msk.bf16.mxu0 %vm769_vm0, %v1060_v38  ;;  %v1307_v63 = vpack.c.bf16 %v1305_v61, %v1304_v60 }
  0x33   : > { %3568 = vmatprep.mubr.msk.bf16.mxu1 %vm769_vm0, %v1142_v42 }
  0x34   : > { %3559 = vmatpush3.bf16.msra.mxu0 %v3761_v34 }
  0x35   : > { %3567 = vmatpush3.bf16.msra.mxu1 %v3762_v35  ;;  %3572 = vmatprep.subr.bf16.mxu0 %v3763_v46 }
  0x36   : > { %3580 = vmatprep.subr.bf16.mxu1 %v3764_v47 }
  0x37   : > { %3561 = vmatmul.mubr.msk.bf16.vlgmr.msra.gmra.mxu0 %vm769_vm0, %v1061_v48 }
  0x38   : > { %3569 = vmatmul.mubr.msk.bf16.vlgmr.msra.gmra.mxu1 %vm769_vm0, %v1143_v49  ;;  %3573 = vmatpush3.bf16.msra.mxu0 %v3763_v46  ;;  %v3389_v49 = vld [vmem:[%s4647_s30] ss:$0 sm:$0xff] }
  0x39   : > { %3581 = vmatpush3.bf16.msra.mxu1 %v3764_v47  ;;  %3574 = vmatprep.subr.bf16.mxu0 %v3765_v50 }
  0x3a   : > { %3582 = vmatprep.subr.bf16.mxu1 %v3766_v54  ;;  %3576 = vmatprep.mubr.msk.bf16.mxu0 %vm769_vm0, %v1224_v55 }
  0x3b   : > { %3584 = vmatprep.mubr.msk.bf16.mxu1 %vm769_vm0, %v1306_v57 }
  0x3c   : > { %3575 = vmatpush3.bf16.msra.mxu0 %v3765_v50 }
  0x3d   : > { %3583 = vmatpush3.bf16.msra.mxu1 %v3766_v54 }
  0x3f   : > { %3577 = vmatmul.mubr.msk.bf16.vlgmr.msra.gmra.mxu0 %vm769_vm0, %v1225_v62 }
  0x40   : > { %3585 = vmatmul.mubr.msk.bf16.vlgmr.msra.gmra.mxu1 %vm769_vm0, %v1307_v63 }
  0xe7   : > { %v3530_v0 = vpop.f32.mrf.mxu0 }
  0xe8   : > { %v3538_v1 = vpop.f32.mrf.mxu1 }
  0xe9   : > { %v810_v2 = vpop.f32.mrf.mxu0  ;;  %v886_v11 = vadd.f32 %v3538_v1, %v3530_v0 }
  0xea   : > { %v877_v3 = vpop.f32.mrf.mxu1 }
  0xeb   : > { %v3531_v4 = vpop.f32.mrf.mxu0  ;;  %v878_v14 = vadd.f32 %v877_v3, %v810_v2 }
  0xec   : > { %v3539_v5 = vpop.f32.mrf.mxu1 }
  0xed   : > { %v813_v6 = vpop.f32.mrf.mxu0  ;;  %v889_v18 = vadd.f32 %v3539_v5, %v3531_v4 }
  0xee   : > { %v880_v7 = vpop.f32.mrf.mxu1 }
  0xef   : > { %v3546_v8 = vpop.f32.mrf.mxu0  ;;  %v881_v25 = vadd.f32 %v880_v7, %v813_v6 }
  0xf0   : > { %v3554_v9 = vpop.f32.mrf.mxu1  ;;  %v972_v15 = vadd.f32 %v3546_v8, %v886_v11 }
  0xf1   : > { %v955_v10 = vpop.f32.mrf.mxu0 }
  0xf2   : > { %v1037_v12 = vpop.f32.mrf.mxu1  ;;  %v970_v19 = vadd.f32 %v955_v10, %v878_v14  ;;  %v1054_v22 = vadd.f32 %v3554_v9, %v972_v15 }
  0xf3   : > { %v3547_v13 = vpop.f32.mrf.mxu0 }
  0xf4   : > { %v3555_v16 = vpop.f32.mrf.mxu1  ;;  %v973_v23 = vadd.f32 %v3547_v13, %v889_v18  ;;  %v1052_v27 = vadd.f32 %v1037_v12, %v970_v19 }
  0xf5   : > { %v958_v17 = vpop.f32.mrf.mxu0 }
  0xf6   : > { %v1040_v20 = vpop.f32.mrf.mxu1  ;;  %v971_v30 = vadd.f32 %v958_v17, %v881_v25  ;;  %v1055_v32 = vadd.f32 %v3555_v16, %v973_v23 }
  0xf7   : > { %v3562_v21 = vpop.f32.mrf.mxu0 }
  0xf8   : > { %v3570_v24 = vpop.f32.mrf.mxu1  ;;  %v1136_v28 = vadd.f32 %v3562_v21, %v1054_v22  ;;  %v1053_v42 = vadd.f32 %v1040_v20, %v971_v30 }
  0xf9   : > { %v1119_v26 = vpop.f32.mrf.mxu0 }
  0xfa   : > { %v1201_v29 = vpop.f32.mrf.mxu1  ;;  %v1134_v33 = vadd.f32 %v1119_v26, %v1052_v27  ;;  %v1218_v38 = vadd.f32 %v3570_v24, %v1136_v28 }
  0xfb   : > { %v3563_v31 = vpop.f32.mrf.mxu0 }
  0xfc   : > { %v3571_v34 = vpop.f32.mrf.mxu1  ;;  %v1137_v39 = vadd.f32 %v3563_v31, %v1055_v32  ;;  %v1216_v45 = vadd.f32 %v1201_v29, %v1134_v33 }
  0xfd   : > { %v1122_v35 = vpop.f32.mrf.mxu0 }
  0xfe   : > { %v1204_v40 = vpop.f32.mrf.mxu1  ;;  %v1135_v48 = vadd.f32 %v1122_v35, %v1053_v42  ;;  %v1219_v51 = vadd.f32 %v3571_v34, %v1137_v39 }
  0xff   : > { %v3578_v44 = vpop.f32.mrf.mxu0 }
 0x100   : > { %v1300_v46 = vadd.f32 %v3578_v44, %v1218_v38  ;;  %v3586_v47 = vpop.f32.mrf.mxu1  ;;  %v1217_v60 = vadd.f32 %v1204_v40, %v1135_v48 }
 0x101   : > { %v1283_v50 = vpop.f32.mrf.mxu0 }
 0x102   : > { %v1382_v52 = vadd.f32 %v3586_v47, %v1300_v46  ;;  %v1298_v53 = vadd.f32 %v1283_v50, %v1216_v45  ;;  %v1365_v54 = vpop.f32.mrf.mxu1 }
 0x103   : > { %v3579_v55 = vpop.f32.mrf.mxu0 }
 0x104   : > { %v4285_v56 = vadd.f32 %v3389_v49, %v1382_v52  ;;  %v1380_v57 = vadd.f32 %v1365_v54, %v1298_v53  ;;  %v1301_v58 = vadd.f32 %v3579_v55, %v1219_v51  ;;  %v3587_v59 = vpop.f32.mrf.mxu1 }
 0x105   : > { %v1286_v61 = vpop.f32.mrf.mxu0 }
 0x106   : > { %v4288_v62 = vmul.f32 0.70710677, %v4285_v56  ;;  %v4290_v63 = vadd.f32 %v3389_v49, %v1380_v57  ;;  %v1383_v0 = vadd.f32 %v3587_v59, %v1301_v58  ;;  %v1299_v1 = vadd.f32 %v1286_v61, %v1217_v60  ;;  %v1368_v4 = vpop.f32.mrf.mxu1 }
 0x108   : > { %v1413_v2 = vand.u32 2147483647, %v4288_v62  ;;  %v4294_v3 = vmul.f32 0.70710677, %v4290_v63  ;;  %v4296_v5 = vadd.f32 %v3389_v49, %v1383_v0  ;;  %v1381_v6 = vadd.f32 %v1368_v4, %v1299_v1 }
 0x109   : > { %vm1405_vm1 = vcmp.ge.f32.partialorder %v4288_v62, 0.0 }
 0x10a   : > { %v1417_v7 = vmul.f32 0.3275911, %v1413_v2  ;;  %v1411_v8 = vand.u32 2147483647, %v4294_v3  ;;  %v4300_v9 = vmul.f32 0.70710677, %v4296_v5  ;;  %v4302_v10 = vadd.f32 %v3389_v49, %v1381_v6 }
 0x10b   : > { %v1469_v20 = vsub.f32 0.0, %v1413_v2  ;;  %vm1403_vm2 = vcmp.ge.f32.partialorder %v4294_v3, 0.0 }
 0x10c   : > { %v1421_v11 = vadd.f32 1.0, %v1417_v7  ;;  %v1415_v12 = vmul.f32 0.3275911, %v1411_v8  ;;  %v1414_v13 = vand.u32 2147483647, %v4300_v9  ;;  %v1467_v22 = vsub.f32 0.0, %v1411_v8 }
 0x10d   : > { %v4306_v14 = vmul.f32 0.70710677, %v4302_v10  ;;  %v1473_v23 = vmul.f32 %v1469_v20, %v1413_v2  ;;  %vm1406_vm3 = vcmp.ge.f32.partialorder %v4300_v9, 0.0 }
 0x10e   : > { %3767 = vrcp.f32 %v1421_v11  ;;  %v1419_v15 = vadd.f32 1.0, %v1415_v12  ;;  %v1418_v16 = vmul.f32 0.3275911, %v1414_v13  ;;  %v1470_v24 = vsub.f32 0.0, %v1414_v13 }
 0x10f   : > { %v1412_v17 = vand.u32 2147483647, %v4306_v14  ;;  %v1471_v26 = vmul.f32 %v1467_v22, %v1411_v8  ;;  %v1479_v27 = vmul.f32 1.442695, %v1473_v23  ;;  %v3923_v22 = vmov -1.0  }
 0x110   : > { %3769 = vrcp.f32 %v1419_v15  ;;  %v1422_v18 = vadd.f32 1.0, %v1418_v16  ;;  %v1474_v30 = vmul.f32 %v1470_v24, %v1414_v13  ;;  %v1409_v23 = vsel %vm1405_vm1, 1.0, %v3923_v22 }
 0x111   : > { %v1416_v19 = vmul.f32 0.3275911, %v1412_v17  ;;  %v1468_v28 = vsub.f32 0.0, %v1412_v17  ;;  %v1475_v33 = vmul.f32 1.442695, %v1471_v26  ;;  %v1410_v3 = vsel %vm1406_vm3, 1.0, %v3923_v22 }
 0x112   : > { %3771 = vrcp.f32 %v1422_v18  ;;  %v1481_v40 = vmul.f32 1.442695, %v1474_v30  ;;  %v1397_v30 = vmul.f32 0.5, %v4285_v56  ;;  %vm1404_vm4 = vcmp.ge.f32.partialorder %v4306_v14, 0.0 }
 0x113   : > { %v1420_v21 = vadd.f32 1.0, %v1416_v19  ;;  %v1472_v38 = vmul.f32 %v1468_v28, %v1412_v17  ;;  %v1398_v56 = vmul.f32 0.5, %v4296_v5 }
 0x115   : > { %3773 = vrcp.f32 %v1420_v21  ;;  %v1477_v49 = vmul.f32 1.442695, %v1472_v38 }
 0x116   : > { %3775 = vpow2.f32 %v1479_v27 }
 0x117   : > { %3777 = vpow2.f32 %v1475_v33 }
 0x118   : > { %3779 = vpow2.f32 %v1481_v40 }
 0x119   : > { %3781 = vpow2.f32 %v1477_v49 }
 0x11b   : > { %v3768_v25 = vpop.eup %3767 }
 0x11c   : > { %v1433_v29 = vmul.f32 1.0614054, %v3768_v25 }
 0x11d   : > { %v3770_v31 = vpop.eup %3769 }
 0x11e   : > { %v1437_v32 = vadd.f32 -1.4531521, %v1433_v29  ;;  %v1431_v34 = vmul.f32 1.0614054, %v3770_v31 }
 0x11f   : > { %v3772_v35 = vpop.eup %3771 }
 0x120   : > { %v1441_v39 = vmul.f32 %v3768_v25, %v1437_v32  ;;  %v1435_v42 = vadd.f32 -1.4531521, %v1431_v34  ;;  %v1434_v44 = vmul.f32 1.0614054, %v3772_v35  ;;  %v1407_v32 = vsel %vm1403_vm2, 1.0, %v3923_v22 }
 0x122   : > { %v1445_v45 = vadd.f32 1.4214138, %v1441_v39  ;;  %v3774_v46 = vpop.eup %3773  ;;  %v1439_v47 = vmul.f32 %v3770_v31, %v1435_v42  ;;  %v1438_v48 = vadd.f32 -1.4531521, %v1434_v44  ;;  %v1395_v42 = vmul.f32 0.5, %v4290_v63 }
 0x123   : > { %v1432_v51 = vmul.f32 1.0614054, %v3774_v46  ;;  %v3776_v11 = vpop.eup %3775 }
 0x124   : > { %v1449_v50 = vmul.f32 %v3768_v25, %v1445_v45  ;;  %v1443_v52 = vadd.f32 1.4214138, %v1439_v47  ;;  %v1442_v53 = vmul.f32 %v3772_v35, %v1438_v48  ;;  %v3778_v19 = vpop.eup %3777  ;;  %v1408_v48 = vsel %vm1404_vm4, 1.0, %v3923_v22 }
 0x125   : > { %v1436_v55 = vadd.f32 -1.4531521, %v1432_v51 }
 0x126   : > { %v1453_v54 = vadd.f32 -0.28449672, %v1449_v50  ;;  %v1447_v57 = vmul.f32 %v3770_v31, %v1443_v52  ;;  %v1446_v58 = vadd.f32 1.4214138, %v1442_v53  ;;  %v1396_v53 = vmul.f32 0.5, %v4302_v10 }
 0x127   : > { %v1440_v60 = vmul.f32 %v3774_v46, %v1436_v55 }
 0x128   : > { %v1457_v59 = vmul.f32 %v3768_v25, %v1453_v54  ;;  %v1451_v61 = vadd.f32 -0.28449672, %v1447_v57  ;;  %v1450_v0 = vmul.f32 %v3772_v35, %v1446_v58 }
 0x129   : > { %v1444_v2 = vadd.f32 1.4214138, %v1440_v60 }
 0x12a   : > { %v1461_v1 = vadd.f32 0.2548296, %v1457_v59  ;;  %v1455_v4 = vmul.f32 %v3770_v31, %v1451_v61  ;;  %v1454_v6 = vadd.f32 -0.28449672, %v1450_v0 }
 0x12b   : > { %v1448_v8 = vmul.f32 %v3774_v46, %v1444_v2 }
 0x12c   : > { %v1465_v7 = vmul.f32 %v3768_v25, %v1461_v1  ;;  %v1459_v12 = vadd.f32 0.2548296, %v1455_v4  ;;  %v1458_v13 = vmul.f32 %v3772_v35, %v1454_v6  ;;  %v3780_v25 = vpop.eup %3779 }
 0x12d   : > { %v1452_v16 = vadd.f32 -0.28449672, %v1448_v8  ;;  %v3782_v34 = vpop.eup %3781 }
 0x12e   : > { %v1485_v15 = vmul.f32 %v3776_v11, %v1465_v7  ;;  %v1463_v17 = vmul.f32 %v3770_v31, %v1459_v12  ;;  %v1462_v18 = vadd.f32 0.2548296, %v1458_v13 }
 0x12f   : > { %v1456_v21 = vmul.f32 %v3774_v46, %v1452_v16 }
 0x130   : > { %v1489_v20 = vsub.f32 1.0, %v1485_v15  ;;  %v1483_v24 = vmul.f32 %v3778_v19, %v1463_v17  ;;  %v1466_v26 = vmul.f32 %v3772_v35, %v1462_v18 }
 0x131   : > { %v1460_v28 = vadd.f32 0.2548296, %v1456_v21 }
 0x132   : > { %v1493_v27 = vmul.f32 %v1489_v20, %v1409_v23  ;;  %v1487_v29 = vsub.f32 1.0, %v1483_v24  ;;  %v1486_v62 = vmul.f32 %v3780_v25, %v1466_v26 }
 0x133   : > { %v1464_v33 = vmul.f32 %v3774_v46, %v1460_v28 }
 0x134   : > { %v1497_v31 = vadd.f32 1.0, %v1493_v27  ;;  %v1491_v38 = vmul.f32 %v1487_v29, %v1407_v32  ;;  %v1490_v39 = vsub.f32 1.0, %v1486_v62  ;;  %v3391_v32 = vld [vmem:[%s4648_s17] ss:$0 sm:$0xff] }
 0x135   : > { %v1484_v35 = vmul.f32 %v3782_v34, %v1464_v33 }
 0x136   : > { %v1501_v40 = vmul.f32 %v1497_v31, %v1397_v30  ;;  %v1495_v44 = vadd.f32 1.0, %v1491_v38  ;;  %v1494_v45 = vmul.f32 %v1490_v39, %v1410_v3  ;;  %v3390_v30 = vld [vmem:[%s4613_s3] ss:$0 sm:$0xff] }
 0x137   : > { %v1488_v47 = vsub.f32 1.0, %v1484_v35 }
 0x138   : > { %v1505_v9 = vadd.f32 %v1501_v40, %v4222_v41  ;;  %v1499_v49 = vmul.f32 %v1495_v44, %v1395_v42  ;;  %v1498_v46 = vadd.f32 1.0, %v1494_v45 }
 0x139   : > { %v1492_v51 = vmul.f32 %v1488_v47, %v1408_v48 }
 0x13a   : > { %v1515_v50 = vsel %vm769_vm0, %v1505_v9, 0.0  ;;  %v1503_v14 = vadd.f32 %v1499_v49, %v4203_v36  ;;  %v1502_v52 = vmul.f32 %v1498_v46, %v1398_v56 }
 0x13b   : > { %1516 = vadd.xlane.f32.xlu1 %v1515_v50  ;;  %v1496_v63 = vadd.f32 1.0, %v1492_v51 }
 0x13c   : > { %v1509_v54 = vsel %vm769_vm0, %v1503_v14, 0.0  ;;  %v1506_v41 = vadd.f32 %v1502_v52, %v4228_v43 }
 0x13d   : > { %1510 = vadd.xlane.f32.xlu0 %v1509_v54  ;;  %v1500_v55 = vmul.f32 %v1496_v63, %v1396_v53 }
 0x13e   : > { %v1518_v5 = vsel %vm769_vm0, %v1506_v41, 0.0 }
 0x13f   : > { %1519 = vadd.xlane.f32.xlu1 %v1518_v5  ;;  %v1504_v57 = vadd.f32 %v1500_v55, %v4208_v37 }
 0x141   : > { %v1512_v58 = vsel %vm769_vm0, %v1504_v57, 0.0 }
 0x142   : > { %1513 = vadd.xlane.f32.xlu0 %v1512_v58 }
 0x1c4   : > { %v1517_v59 = vpop.xlane.xlu1 %1516 }
 0x1c5   : > { %v1524_v36 = vmul.f32 0.03125, %v1517_v59 }
 0x1c6   : > { %v1511_v60 = vpop.xlane.xlu0 %1510 }
 0x1c7   : > { %v1522_v61 = vmul.f32 0.03125, %v1511_v60  ;;  %v1528_v0 = vsub.f32 %v1505_v9, %v1524_v36 }
 0x1c8   : > { %v1520_v10 = vpop.xlane.xlu1 %1519 }
 0x1c9   : > { %v1526_v1 = vsub.f32 %v1503_v14, %v1522_v61  ;;  %v1525_v2 = vmul.f32 0.03125, %v1520_v10  ;;  %v1532_v8 = vmul.f32 %v1528_v0, %v1528_v0 }
 0x1cb   : > { %v1514_v4 = vpop.xlane.xlu0 %1513  ;;  %v1530_v43 = vmul.f32 %v1526_v1, %v1526_v1  ;;  %v1529_v11 = vsub.f32 %v1506_v41, %v1525_v2  ;;  %v1540_v13 = vsel %vm769_vm0, %v1532_v8, 0.0 }
 0x1cc   : > { %v1523_v6 = vmul.f32 0.03125, %v1514_v4 }
 0x1cd   : > { %v1534_v7 = vsel %vm769_vm0, %v1530_v43, 0.0  ;;  %v1533_v16 = vmul.f32 %v1529_v11, %v1529_v11 }
 0x1ce   : > { %v1527_v12 = vsub.f32 %v1504_v57, %v1523_v6  ;;  %1535 = vadd.xlane.f32.xlu0 %v1534_v7 }
 0x1cf   : > { %v1543_v17 = vsel %vm769_vm0, %v1533_v16, 0.0 }
 0x1d0   : > { %v1531_v37 = vmul.f32 %v1527_v12, %v1527_v12 }
 0x1d2   : > { %1541 = vadd.xlane.f32.xlu0 %v1540_v13  ;;  %v1537_v15 = vsel %vm769_vm0, %v1531_v37, 0.0 }
 0x1d3   : > { %1538 = vadd.xlane.f32.xlu1 %v1537_v15 }
 0x1d7   : > { %1544 = vadd.xlane.f32.xlu1 %v1543_v17 }
 0x257   : > { %v1536_v18 = vpop.xlane.xlu0 %1535 }
 0x258   : > { %v1546_v19 = vmul.f32 0.03125, %v1536_v18 }
 0x25a   : > { %v1550_v20 = vadd.f32 1e-05, %v1546_v19 }
 0x25b   : > { %v1542_v21 = vpop.xlane.xlu0 %1541 }
 0x25c   : > { %3783 = vrsqrt.f32 %v1550_v20  ;;  %v1539_v22 = vpop.xlane.xlu1 %1538  ;;  %v1548_v23 = vmul.f32 0.03125, %v1542_v21 }
 0x25d   : > { %v1547_v24 = vmul.f32 0.03125, %v1539_v22 }
 0x25e   : > { %v1552_v26 = vadd.f32 1e-05, %v1548_v23 }
 0x25f   : > { %v1551_v25 = vadd.f32 1e-05, %v1547_v24 }
 0x260   : > { %3785 = vrsqrt.f32 %v1552_v26  ;;  %v1545_v27 = vpop.xlane.xlu1 %1544 }
 0x261   : > { %3787 = vrsqrt.f32 %v1551_v25  ;;  %v1549_v28 = vmul.f32 0.03125, %v1545_v27 }
 0x263   : > { %v1553_v29 = vadd.f32 1e-05, %v1549_v28 }
 0x265   : > { %3789 = vrsqrt.f32 %v1553_v29 }
 0x269   : > { %v3784_v62 = vpop.eup %3783 }
 0x26a   : > { %v1558_v31 = vmul.f32 %v3784_v62, %v1526_v1 }
 0x26c   : > { %v1568_v33 = vmul.f32 %v3390_v30, %v1558_v31 }
 0x26d   : > { %v3786_v34 = vpop.eup %3785 }
 0x26e   : > { %v3788_v38 = vpop.eup %3787  ;;  %v1578_v39 = vadd.f32 %v3391_v32, %v1568_v33  ;;  %v1560_v3 = vmul.f32 %v3786_v34, %v1528_v0 }
 0x26f   : > { %v1559_v40 = vmul.f32 %v3788_v38, %v1527_v12 }
 0x270   : > { %1582 = vst.msk [vmem:[#allocation2] sm:$0xff] %vm769_vm0, %v1578_v39  ;;  %v1570_v35 = vmul.f32 %v3390_v30, %v1560_v3 }
 0x271   : > { %v1569_v42 = vmul.f32 %v3390_v30, %v1559_v40 }
 0x272   : > { %v3790_v44 = vpop.eup %3789  ;;  %v1580_v45 = vadd.f32 %v3391_v32, %v1570_v35 }
 0x273   : > { %v1579_v9 = vadd.f32 %v3391_v32, %v1569_v42  ;;  %v1561_v47 = vmul.f32 %v3790_v44, %v1529_v11 }
 0x274   : > { %1584 = vst.msk [vmem:[#allocation2 + $0x10] sm:$0xff] %vm769_vm0, %v1580_v45 }
 0x275   : > { %1583 = vst.msk [vmem:[#allocation2 + $0x8] sm:$0xff] %vm769_vm0, %v1579_v9  ;;  %v1571_v56 = vmul.f32 %v3390_v30, %v1561_v47 }
 0x277   : > { %v1581_v48 = vadd.f32 %v3391_v32, %v1571_v56 }
 0x279   : > { %1585 = vst.msk [vmem:[#allocation2 + $0x18] sm:$0xff] %vm769_vm0, %v1581_v48 }
 0x27a PF: > { %v3821_v49 = vld [vmem:[%s4063_s22 + $0x8] sm:$0xff]   ;;  %v3822_v46 = vld [vmem:[%s4063_s22] sm:$0xff]   ;;  %vm1615_vm5 = vcmask 261120   ;;  %v3924_v54 = vmov 0.0   ;;  %s4649_s18 = scalar_lea.vmem %s4616_s6, %s4053_s29  ;;  %vm3925_vm6 = vmmov 0   ;;  %s3926_s1 = smov 96  }
 0x27b   : > { %3588 = vmatprep.subr.bf16.mxu0 %v3821_v49  ;;  %v1586_v50 = vld [vmem:[#allocation2] sm:$0xff]  ;;  %v1588_v14 = vld [vmem:[#allocation2 + $0x10] sm:$0xff]  ;;  %3596 = vmatprep.subr.bf16.mxu1 %v3924_v54  ;;  %vm1682_vm7 = vcmask 64512   ;;  %vm1780_vm8 = vcmask 130048   ;;  %s3927_s19 = smov 64   ;;  %s3928_s30 = smov 88  }
 0x27c   : > { %v1587_v51 = vld [vmem:[#allocation2 + $0x8] sm:$0xff]  ;;  %3589 = vmatpush3.bf16.msra.mxu0 %v3821_v49  ;;  %v3392_v55 = vld [vmem:[%s4649_s18] ss:$0 sm:$0xff]  ;;  %3598 = vmatprep.mubr.msk.bf16.mxu1 %vm3925_vm6, %v3924_v54  ;;  %s3929_s21 = smov 120   ;;  %s3930_s23 = smov 56   ;;  %vm2705_vm9 = vcmask 195584  }
 0x27d   : > { %v1590_v52 = vpack.c.bf16 %v1587_v51, %v1586_v50  ;;  %3590 = vmatprep.subr.bf16.mxu0 %v3822_v46  ;;  %s3931_s24 = smov 80   ;;  %s3932_s26 = smov 112   ;;  %vm2994_vm10 = vcmask 523264  }
 0x27e   : > { %s3933_s17 = smov 48   ;;  %s3934_s22 = smov 72  }
 0x27f   : > { %3592 = vmatprep.mubr.msk.bf16.mxu0 %vm1615_vm5, %v1590_v52  ;;  %s3935_s4 = smov 104   ;;  %s3936_s18 = smov 40  }
 0x280   : > { %v1589_v53 = vld [vmem:[#allocation2 + $0x18] sm:$0xff]  ;;  %3591 = vmatpush3.bf16.msra.mxu0 %v3822_v46  ;;  %p3434_p5 = scmp.ne.s32.totalorder %s4047_s28, 1 }
 0x281   : > { %v1591_v63 = vpack.c.bf16 %v1589_v53, %v1588_v14  ;;  %3602 = vmatprep.subr.bf16.mxu0 %v3924_v54 }
 0x283   : > { %3593 = vmatmul.mubr.msk.bf16.vlgmr.msra.gmra.mxu0 %vm1615_vm5, %v1591_v63 }
 0x284   : > { %3604 = vmatprep.mubr.msk.bf16.mxu0 %vm3925_vm6, %v3924_v54 }
 0x343   : > { %v3594_v41 = vpop.f32.mrf.mxu0 }
 0x344   : > { %v1665_v57 = vadd.f32 %v3594_v41, %v3392_v55 }
 0x345   : > { %v1656_v5 = vpop.f32.mrf.mxu0 }
 0x346   : > { %v1657_v59 = vadd.f32 %v3392_v55, %v1656_v5  ;;  %v1673_v61 = vmul.f32 0.35355338, %v1665_v57 }
 0x347   : > { %v3595_v58 = vpop.f32.mrf.mxu0 }
 0x348   : > { %v1668_v36 = vadd.f32 %v3595_v58, %v3392_v55  ;;  %v1671_v1 = vmul.f32 0.35355338, %v1657_v59 }
 0x349   : > { %v1659_v60 = vpop.f32.mrf.mxu0 }
 0x34a   : > { %v1674_v10 = vmul.f32 0.35355338, %v1668_v36  ;;  %v1660_v0 = vadd.f32 %v3392_v55, %v1659_v60  ;;  %v4361_v7 = vpack.c.bf16 %v1668_v36, %v1665_v57 }
 0x34c   : > { %v4354_v2 = vpack.c.bf16 %v1674_v10, %v1673_v61  ;;  %v1672_v4 = vmul.f32 0.35355338, %v1660_v0  ;;  %v4356_v43 = vpack.c.bf16 %v1660_v0, %v1657_v59 }
 0x34e   : > { %v4358_v6 = vpack.c.bf16 %v1672_v4, %v1671_v1  ;;  %1680 = vrot.lane.b32.xlu0 %v4356_v43, %s3926_s1 }
 0x352   : > { %1731 = vrot.lane.b32.xlu0 %v4361_v7, %s3926_s1  ;;  %s3937_s1 = smov 8  }
 0x3c0   : > { %v1681_v8 = vpop.permute.xlu0 %1680 }
 0x3c1   : > { %v1687_v11 = vsel %vm1682_vm7, %v1681_v8, 0 }
 0x3c2   : > { %3597 = vmatpush3.bf16.xpose.msra.mxu1 %v1687_v11 }
 0x3c3   : > { %3608 = vmatprep.subr.bf16.mxu1 %v3924_v54 }
 0x3c4   : > { %v1732_v12 = vpop.permute.xlu0 %1731 }
 0x3c5   : > { %v1737_v37 = vsel %vm1682_vm7, %v1732_v12, 0 }
 0x3c6   : > { %3603 = vmatpush3.bf16.xpose.msra.mxu0 %v1737_v37 }
 0x3c7   : > { %3614 = vmatprep.subr.bf16.mxu0 %v3924_v54 }
 0x3c9   : > { %3599 = vmatmul.mubr.msk.bf16.vlgmr.msra.gmra.mxu1 %vm1682_vm7, %v4358_v6 }
 0x3ca   : > { %3610 = vmatprep.mubr.msk.bf16.mxu1 %vm3925_vm6, %v3924_v54 }
 0x3cd   : > { %3605 = vmatmul.mubr.msk.bf16.vlgmr.msra.gmra.mxu0 %vm1682_vm7, %v4354_v2 }
 0x3ce   : > { %3616 = vmatprep.mubr.msk.bf16.mxu0 %vm3925_vm6, %v3924_v54 }
 0x489   : > { %v1723_v13 = vpop.f32.mrf.mxu1 }
 0x48a   : > { %v1781_v15 = vsel %vm1780_vm8, %v1723_v13, -inf }
 0x48b   : > { %1782 = vmax.xlane.f32.xlu1 %v1781_v15  ;;  %v3600_v16 = vpop.f32.mrf.mxu1 }
 0x48d   : > { %v1726_v17 = vpop.f32.mrf.mxu1  ;;  %v1773_v18 = vpop.f32.mrf.mxu0 }
 0x48e   : > { %v1787_v19 = vsel %vm1780_vm8, %v1773_v18, -inf  ;;  %v1784_v20 = vsel %vm1780_vm8, %v1726_v17, -inf }
 0x48f   : > { %1788 = vmax.xlane.f32.xlu0 %v1787_v19  ;;  %v3606_v21 = vpop.f32.mrf.mxu0  ;;  %1785 = vmax.xlane.f32.xlu1 %v1784_v20  ;;  %v3601_v22 = vpop.f32.mrf.mxu1 }
 0x491   : > { %v1776_v23 = vpop.f32.mrf.mxu0 }
 0x492   : > { %v1790_v24 = vsel %vm1780_vm8, %v1776_v23, -inf }
 0x493   : > { %v3607_v26 = vpop.f32.mrf.mxu0  ;;  %1791 = vmax.xlane.f32.xlu1 %v1790_v24 }
 0x4a4   : > { %1827 = vrot.lane.b32.xlu1 %v4356_v43, %s3927_s19 }
 0x4a5   : > { %1874 = vrot.lane.b32.xlu0 %v4361_v7, %s3927_s19  ;;  %s3938_s19 = smov 16  }
 0x4a8   : > { %1924 = vrot.lane.b32.xlu1 %v4356_v43, %s3928_s30 }
 0x4ac   : > { %1976 = vrot.lane.b32.xlu1 %v4361_v7, %s3928_s30  ;;  %s4650_s30 = sld [smem:[#allocation4_spill]] }
 0x514   : > { %v1783_v25 = vpop.xlane.xlu1 %1782 }
 0x515   : > { %v1793_v27 = vsub.f32 %v1723_v13, %v1783_v25 }
 0x517   : > { %v1797_v30 = vmul.f32 1.442695, %v1793_v27 }
 0x518   : > { %v1789_v28 = vpop.xlane.xlu0 %1788  ;;  %v1786_v29 = vpop.xlane.xlu1 %1785 }
 0x519   : > { %v1795_v62 = vsub.f32 %v1773_v18, %v1789_v28  ;;  %v1794_v38 = vsub.f32 %v1726_v17, %v1786_v29 }
 0x51b   : > { %v1801_v31 = vmul.f32 1.442695, %v1795_v62  ;;  %v1799_v40 = vmul.f32 1.442695, %v1794_v38 }
 0x51c   : > { %v1875_v32 = vpop.permute.xlu0 %1874  ;;  %v1792_v33 = vpop.xlane.xlu1 %1791 }
 0x51d   : > { %3831 = vpow2.f32 %v1801_v31  ;;  %v1796_v34 = vsub.f32 %v1776_v23, %v1792_v33  ;;  %3615 = vmatpush3.bf16.msra.mxu0 %v1875_v32 }
 0x51e   : > { %3626 = vmatprep.subr.bf16.mxu0 %v3924_v54  ;;  %3833 = vpow2.f32 %v1797_v30 }
 0x51f   : > { %v1803_v39 = vmul.f32 1.442695, %v1796_v34 }
 0x520   : > { %v1828_v3 = vpop.permute.xlu1 %1827 }
 0x521   : > { %3609 = vmatpush3.bf16.msra.mxu1 %v1828_v3  ;;  %3835 = vpow2.f32 %v1803_v39 }
 0x522   : > { %3620 = vmatprep.subr.bf16.mxu1 %v3924_v54  ;;  %3837 = vpow2.f32 %v1799_v40 }
 0x524   : > { %v1925_v49 = vpop.permute.xlu1 %1924 }
 0x525   : > { %v1930_v0 = vsel %vm1682_vm7, %v1925_v49, 0 }
 0x528   : > { %v1977_v46 = vpop.permute.xlu1 %1976 }
 0x529   : > { %v1982_v59 = vsel %vm1682_vm7, %v1977_v46, 0 }
 0x52a   : > { %v3832_v35 = vpop.eup %3831 }
 0x52b   : > { %v1811_v42 = vsel %vm1780_vm8, %v3832_v35, 0.0  ;;  %v3834_v44 = vpop.eup %3833 }
 0x52c   : > { %1812 = vadd.xlane.f32.xlu1 %v1811_v42  ;;  %v1805_v45 = vsel %vm1780_vm8, %v3834_v44, 0.0 }
 0x52e   : > { %v3836_v9 = vpop.eup %3835 }
 0x52f   : > { %v1814_v47 = vsel %vm1780_vm8, %v3836_v9, 0.0  ;;  %v3838_v56 = vpop.eup %3837 }
 0x530   : > { %1806 = vadd.xlane.f32.xlu1 %v1805_v45  ;;  %v1808_v48 = vsel %vm1780_vm8, %v3838_v56, 0.0 }
 0x534   : > { %1815 = vadd.xlane.f32.xlu1 %v1814_v47 }
 0x538   : > { %1809 = vadd.xlane.f32.xlu1 %v1808_v48 }
 0x549   : > { %1922 = vrot.lane.b32.xlu1 %v4358_v6, %s3929_s21 }
 0x54d   : > { %1974 = vrot.lane.b32.xlu1 %v4354_v2, %s3929_s21  ;;  %s3939_s21 = smov 24  }
 0x5b5   : > { %v1813_v50 = vpop.xlane.xlu1 %1812 }
 0x5b6   : > { %3839 = vrcp.f32 %v1813_v50 }
 0x5b9   : > { %v1807_v51 = vpop.xlane.xlu1 %1806 }
 0x5bd   : > { %v1816_v14 = vpop.xlane.xlu1 %1815 }
 0x5be   : > { %3841 = vrcp.f32 %v1816_v14 }
 0x5bf   : > { %3843 = vrcp.f32 %v1807_v51 }
 0x5c1   : > { %v1810_v52 = vpop.xlane.xlu1 %1809 }
 0x5c2   : > { %3845 = vrcp.f32 %v1810_v52 }
 0x5c3   : > { %v3840_v53 = vpop.eup %3839 }
 0x5c4   : > { %v1823_v41 = vmul.f32 %v3840_v53, %v3832_v35 }
 0x5c5   : > { %v1923_v61 = vpop.permute.xlu1 %1922 }
 0x5c9   : > { %v1975_v1 = vpop.permute.xlu1 %1974 }
 0x5cb   : > { %v3842_v63 = vpop.eup %3841 }
 0x5cc   : > { %v1824_v55 = vmul.f32 %v3842_v63, %v3836_v9  ;;  %v3844_v5 = vpop.eup %3843 }
 0x5cd   : > { %v1821_v36 = vmul.f32 %v3844_v5, %v3834_v44 }
 0x5ce   : > { %v1826_v57 = vpack.c.bf16 %v1824_v55, %v1823_v41 }
 0x5cf   : > { %v3846_v58 = vpop.eup %3845 }
 0x5d0   : > { %3617 = vmatmul.mubr.msk.bf16.vlgmr.msra.gmra.mxu0 %vm1780_vm8, %v1826_v57  ;;  %v1822_v60 = vmul.f32 %v3846_v58, %v3838_v56 }
 0x5d1   : > { %3627 = vmatpush3.bf16.xpose.msra.mxu0 %v1982_v59  ;;  %3628 = vmatprep.mubr.msk.bf16.mxu0 %vm3925_vm6, %v3924_v54 }
 0x5d2   : > { %v1825_v10 = vpack.c.bf16 %v1822_v60, %v1821_v36  ;;  %3638 = vmatprep.subr.bf16.mxu0 %v3924_v54 }
 0x5d4   : > { %3611 = vmatmul.mubr.msk.bf16.vlgmr.msra.gmra.mxu1 %vm1780_vm8, %v1825_v10 }
 0x5d5   : > { %3621 = vmatpush3.bf16.xpose.msra.mxu1 %v1930_v0  ;;  %3622 = vmatprep.mubr.msk.bf16.mxu1 %vm3925_vm6, %v3924_v54 }
 0x5d6   : > { %3632 = vmatprep.subr.bf16.mxu1 %v3924_v54 }
 0x5d8   : > { %3629 = vmatmul.mubr.msk.bf16.vlgmr.msra.gmra.mxu0 %vm1682_vm7, %v1975_v1 }
 0x5d9   : > { %3640 = vmatprep.mubr.msk.bf16.mxu0 %vm3925_vm6, %v3924_v54 }
 0x5dc   : > { %3623 = vmatmul.mubr.msk.bf16.vlgmr.msra.gmra.mxu1 %vm1682_vm7, %v1923_v61 }
 0x5dd   : > { %3634 = vmatprep.mubr.msk.bf16.mxu1 %vm3925_vm6, %v3924_v54 }
 0x690   : > { %v4408_v4 = vpop.f32.mrf.mxu0 }
 0x692   : > { %v3618_v8 = vpop.f32.mrf.mxu0 }
 0x694   : > { %v4410_v11 = vpop.f32.mrf.mxu1  ;;  %v4412_v12 = vpop.f32.mrf.mxu0 }
 0x696   : > { %v3612_v37 = vpop.f32.mrf.mxu1  ;;  %v3619_v13 = vpop.f32.mrf.mxu0 }
 0x698   : > { %v4414_v15 = vpop.f32.mrf.mxu1  ;;  %v2018_v16 = vpop.f32.mrf.mxu0 }
 0x699   : > { %v2031_v26 = vsel %vm1780_vm8, %v2018_v16, -inf }
 0x69a   : > { %v3613_v17 = vpop.f32.mrf.mxu1  ;;  %v3630_v18 = vpop.f32.mrf.mxu0 }
 0x69c   : > { %v1966_v19 = vpop.f32.mrf.mxu1  ;;  %v2021_v20 = vpop.f32.mrf.mxu0 }
 0x69d   : > { %v2025_v21 = vsel %vm1780_vm8, %v1966_v19, -inf  ;;  %v2034_v28 = vsel %vm1780_vm8, %v2021_v20, -inf }
 0x69e   : > { %v3631_v22 = vpop.f32.mrf.mxu0  ;;  %2026 = vmax.xlane.f32.xlu0 %v2025_v21  ;;  %v3624_v23 = vpop.f32.mrf.mxu1 }
 0x6a0   : > { %v1969_v24 = vpop.f32.mrf.mxu1 }
 0x6a1   : > { %v2028_v25 = vsel %vm1780_vm8, %v1969_v24, -inf }
 0x6a2   : > { %2032 = vmax.xlane.f32.xlu0 %v2031_v26  ;;  %2029 = vmax.xlane.f32.xlu1 %v2028_v25  ;;  %v3625_v27 = vpop.f32.mrf.mxu1 }
 0x6a6   : > { %2035 = vmax.xlane.f32.xlu0 %v2034_v28 }
 0x6b3   : > { %2071 = vrot.lane.b32.xlu1 %v4356_v43, %s3930_s23 }
 0x727   : > { %v2027_v29 = vpop.xlane.xlu0 %2026 }
 0x728   : > { %v2037_v62 = vsub.f32 %v1966_v19, %v2027_v29 }
 0x72a   : > { %v2041_v33 = vmul.f32 1.442695, %v2037_v62 }
 0x72b   : > { %v2033_v30 = vpop.xlane.xlu0 %2032  ;;  %v2030_v31 = vpop.xlane.xlu1 %2029 }
 0x72c   : > { %v2039_v32 = vsub.f32 %v2018_v16, %v2033_v30  ;;  %v2038_v38 = vsub.f32 %v1969_v24, %v2030_v31 }
 0x72e   : > { %v2045_v34 = vmul.f32 1.442695, %v2039_v32  ;;  %v2043_v35 = vmul.f32 1.442695, %v2038_v38 }
 0x72f   : > { %v2036_v39 = vpop.xlane.xlu0 %2035  ;;  %v2072_v3 = vpop.permute.xlu1 %2071 }
 0x730   : > { %3847 = vpow2.f32 %v2045_v34  ;;  %v2040_v40 = vsub.f32 %v2021_v20, %v2036_v39  ;;  %3633 = vmatpush3.bf16.msra.mxu1 %v2072_v3 }
 0x731   : > { %3644 = vmatprep.subr.bf16.mxu1 %v3924_v54  ;;  %3849 = vpow2.f32 %v2041_v33 }
 0x732   : > { %v2047_v42 = vmul.f32 1.442695, %v2040_v40 }
 0x734   : > { %3851 = vpow2.f32 %v2047_v42 }
 0x735   : > { %3853 = vpow2.f32 %v2043_v35 }
 0x73d   : > { %v3848_v44 = vpop.eup %3847 }
 0x73e   : > { %v2055_v45 = vsel %vm1780_vm8, %v3848_v44, 0.0  ;;  %v3850_v9 = vpop.eup %3849 }
 0x73f   : > { %2056 = vadd.xlane.f32.xlu1 %v2055_v45  ;;  %v2049_v48 = vsel %vm1780_vm8, %v3850_v9, 0.0 }
 0x741   : > { %v3852_v47 = vpop.eup %3851 }
 0x742   : > { %v2058_v56 = vsel %vm1780_vm8, %v3852_v47, 0.0  ;;  %v3854_v49 = vpop.eup %3853 }
 0x743   : > { %2059 = vadd.xlane.f32.xlu0 %v2058_v56  ;;  %2050 = vadd.xlane.f32.xlu1 %v2049_v48  ;;  %v2052_v46 = vsel %vm1780_vm8, %v3854_v49, 0.0 }
 0x747   : > { %2053 = vadd.xlane.f32.xlu0 %v2052_v46 }
 0x754   : > { %2167 = vrot.lane.b32.xlu1 %v4356_v43, %s3931_s24 }
 0x758   : > { %2218 = vrot.lane.b32.xlu1 %v4361_v7, %s3931_s24 }
 0x75c   : > { %2216 = vrot.lane.b32.xlu1 %v4354_v2, %s3932_s26 }
 0x75d   : > { %2118 = vrot.lane.b32.xlu0 %v4361_v7, %s3930_s23 }
 0x761   : > { %2165 = vrot.lane.b32.xlu0 %v4358_v6, %s3932_s26  ;;  %s4651_s26 = scalar_lea.vmem %s4618_s8, %s4053_s29 }
 0x7c8   : > { %v2057_v50 = vpop.xlane.xlu1 %2056 }
 0x7c9   : > { %3855 = vrcp.f32 %v2057_v50 }
 0x7cc   : > { %v2060_v51 = vpop.xlane.xlu0 %2059  ;;  %v2051_v14 = vpop.xlane.xlu1 %2050 }
 0x7cd   : > { %3857 = vrcp.f32 %v2060_v51 }
 0x7ce   : > { %3859 = vrcp.f32 %v2051_v14 }
 0x7d0   : > { %v2054_v52 = vpop.xlane.xlu0 %2053  ;;  %v2168_v63 = vpop.permute.xlu1 %2167 }
 0x7d1   : > { %3861 = vrcp.f32 %v2054_v52  ;;  %v2173_v8 = vsel %vm1682_vm7, %v2168_v63, 0 }
 0x7d4   : > { %v2119_v53 = vpop.permute.xlu0 %2118  ;;  %v2219_v59 = vpop.permute.xlu1 %2218 }
 0x7d5   : > { %3639 = vmatpush3.bf16.msra.mxu0 %v2119_v53  ;;  %v2224_v61 = vsel %vm1682_vm7, %v2219_v59, 0 }
 0x7d6   : > { %3650 = vmatprep.subr.bf16.mxu0 %v3924_v54  ;;  %v3856_v41 = vpop.eup %3855 }
 0x7d7   : > { %v2067_v5 = vmul.f32 %v3856_v41, %v3848_v44 }
 0x7d8   : > { %v2217_v37 = vpop.permute.xlu1 %2216  ;;  %v2166_v13 = vpop.permute.xlu0 %2165 }
 0x7da   : > { %v3858_v55 = vpop.eup %3857 }
 0x7db   : > { %v2068_v57 = vmul.f32 %v3858_v55, %v3852_v47  ;;  %v3860_v58 = vpop.eup %3859 }
 0x7dc   : > { %v2065_v10 = vmul.f32 %v3860_v58, %v3850_v9 }
 0x7dd   : > { %v2070_v36 = vpack.c.bf16 %v2068_v57, %v2067_v5 }
 0x7de   : > { %v3862_v60 = vpop.eup %3861 }
 0x7df   : > { %3641 = vmatmul.mubr.msk.bf16.vlgmr.msra.gmra.mxu0 %vm1780_vm8, %v2070_v36  ;;  %v2066_v0 = vmul.f32 %v3862_v60, %v3854_v49 }
 0x7e0   : > { %3651 = vmatpush3.bf16.xpose.msra.mxu0 %v2224_v61  ;;  %3652 = vmatprep.mubr.msk.bf16.mxu0 %vm3925_vm6, %v3924_v54 }
 0x7e1   : > { %v2069_v1 = vpack.c.bf16 %v2066_v0, %v2065_v10  ;;  %3662 = vmatprep.subr.bf16.mxu0 %v3924_v54 }
 0x7e3   : > { %3635 = vmatmul.mubr.msk.bf16.vlgmr.msra.gmra.mxu1 %vm1780_vm8, %v2069_v1 }
 0x7e4   : > { %3645 = vmatpush3.bf16.xpose.msra.mxu1 %v2173_v8  ;;  %3646 = vmatprep.mubr.msk.bf16.mxu1 %vm3925_vm6, %v3924_v54 }
 0x7e5   : > { %3656 = vmatprep.subr.bf16.mxu1 %v3924_v54 }
 0x7e7   : > { %3653 = vmatmul.mubr.msk.bf16.vlgmr.msra.gmra.mxu0 %vm1682_vm7, %v2217_v37 }
 0x7e8   : > { %3664 = vmatprep.mubr.msk.bf16.mxu0 %vm3925_vm6, %v3924_v54 }
 0x7eb   : > { %3647 = vmatmul.mubr.msk.bf16.vlgmr.msra.gmra.mxu1 %vm1682_vm7, %v2166_v13 }
 0x7ec   : > { %3658 = vmatprep.mubr.msk.bf16.mxu1 %vm3925_vm6, %v3924_v54 }
 0x89f   : > { %v4450_v16 = vpop.f32.mrf.mxu0 }
 0x8a1   : > { %v3642_v17 = vpop.f32.mrf.mxu0 }
 0x8a3   : > { %v4452_v18 = vpop.f32.mrf.mxu1  ;;  %v4454_v19 = vpop.f32.mrf.mxu0 }
 0x8a4   : > { %v3796_v20 = vpack.i.bf16 %v4454_v19, %v4450_v16 }
 0x8a5   : > { %v3636_v21 = vpop.f32.mrf.mxu1  ;;  %v3643_v22 = vpop.f32.mrf.mxu0 }
 0x8a7   : > { %v4458_v23 = vpop.f32.mrf.mxu1  ;;  %v2260_v24 = vpop.f32.mrf.mxu0 }
 0x8a8   : > { %v3791_v26 = vpack.i.bf16 %v4458_v23, %v4452_v18  ;;  %v2273_v33 = vsel %vm1780_vm8, %v2260_v24, -inf }
 0x8a9   : > { %v3637_v25 = vpop.f32.mrf.mxu1  ;;  %v3654_v27 = vpop.f32.mrf.mxu0 }
 0x8ab   : > { %v2209_v28 = vpop.f32.mrf.mxu1  ;;  %v2263_v29 = vpop.f32.mrf.mxu0 }
 0x8ac   : > { %v2267_v62 = vsel %vm1780_vm8, %v2209_v28, -inf  ;;  %v2276_v39 = vsel %vm1780_vm8, %v2263_v29, -inf }
 0x8ad   : > { %v3655_v30 = vpop.f32.mrf.mxu0  ;;  %2268 = vmax.xlane.f32.xlu0 %v2267_v62  ;;  %v3648_v31 = vpop.f32.mrf.mxu1 }
 0x8af   : > { %v2212_v32 = vpop.f32.mrf.mxu1 }
 0x8b0   : > { %v2270_v34 = vsel %vm1780_vm8, %v2212_v32, -inf }
 0x8b1   : > { %2274 = vmax.xlane.f32.xlu0 %v2273_v33  ;;  %2271 = vmax.xlane.f32.xlu1 %v2270_v34  ;;  %v3649_v38 = vpop.f32.mrf.mxu1 }
 0x8b5   : > { %2277 = vmax.xlane.f32.xlu0 %v2276_v39 }
 0x8c2   : > { %2313 = vrot.lane.b32.xlu1 %v4356_v43, %s3933_s17 }
 0x936   : > { %v2269_v3 = vpop.xlane.xlu0 %2268 }
 0x937   : > { %v2279_v40 = vsub.f32 %v2209_v28, %v2269_v3 }
 0x939   : > { %v2283_v45 = vmul.f32 1.442695, %v2279_v40 }
 0x93a   : > { %v2275_v35 = vpop.xlane.xlu0 %2274  ;;  %v2272_v42 = vpop.xlane.xlu1 %2271 }
 0x93b   : > { %v2281_v44 = vsub.f32 %v2260_v24, %v2275_v35  ;;  %v2280_v47 = vsub.f32 %v2212_v32, %v2272_v42 }
 0x93d   : > { %v2287_v9 = vmul.f32 1.442695, %v2281_v44  ;;  %v2285_v46 = vmul.f32 1.442695, %v2280_v47 }
 0x93e   : > { %v2278_v56 = vpop.xlane.xlu0 %2277  ;;  %v2314_v48 = vpop.permute.xlu1 %2313 }
 0x93f   : > { %3863 = vpow2.f32 %v2287_v9  ;;  %v2282_v49 = vsub.f32 %v2263_v29, %v2278_v56  ;;  %3657 = vmatpush3.bf16.msra.mxu1 %v2314_v48 }
 0x940   : > { %3668 = vmatprep.subr.bf16.mxu1 %v3924_v54  ;;  %3865 = vpow2.f32 %v2283_v45 }
 0x941   : > { %v2289_v50 = vmul.f32 1.442695, %v2282_v49 }
 0x943   : > { %3867 = vpow2.f32 %v2289_v50 }
 0x944   : > { %3869 = vpow2.f32 %v2285_v46 }
 0x94c   : > { %v3864_v51 = vpop.eup %3863 }
 0x94d   : > { %v2297_v14 = vsel %vm1780_vm8, %v3864_v51, 0.0  ;;  %v3866_v52 = vpop.eup %3865 }
 0x94e   : > { %2298 = vadd.xlane.f32.xlu1 %v2297_v14  ;;  %v2291_v41 = vsel %vm1780_vm8, %v3866_v52, 0.0 }
 0x950   : > { %v3868_v53 = vpop.eup %3867 }
 0x951   : > { %v2300_v63 = vsel %vm1780_vm8, %v3868_v53, 0.0  ;;  %v3870_v55 = vpop.eup %3869 }
 0x952   : > { %2301 = vadd.xlane.f32.xlu0 %v2300_v63  ;;  %2292 = vadd.xlane.f32.xlu1 %v2291_v41  ;;  %v2294_v5 = vsel %vm1780_vm8, %v3870_v55, 0.0 }
 0x956   : > { %2295 = vadd.xlane.f32.xlu0 %v2294_v5 }
 0x963   : > { %2409 = vrot.lane.b32.xlu1 %v4356_v43, %s3934_s22 }
 0x967   : > { %2460 = vrot.lane.b32.xlu1 %v4361_v7, %s3934_s22  ;;  %s4652_s22 = scalar_lea.vmem %s4619_s9, %s4053_s29 }
 0x96b   : > { %2458 = vrot.lane.b32.xlu1 %v4354_v2, %s3935_s4 }
 0x96c   : > { %2360 = vrot.lane.b32.xlu0 %v4361_v7, %s3933_s17 }
 0x970   : > { %2407 = vrot.lane.b32.xlu0 %v4358_v6, %s3935_s4  ;;  %s4655_s4 = sld [smem:[#allocation12_spill]] (!%p3434_p5) }
 0x9d7   : > { %v2299_v57 = vpop.xlane.xlu1 %2298 }
 0x9d8   : > { %3871 = vrcp.f32 %v2299_v57 }
 0x9db   : > { %v2302_v58 = vpop.xlane.xlu0 %2301  ;;  %v2293_v59 = vpop.xlane.xlu1 %2292 }
 0x9dc   : > { %3873 = vrcp.f32 %v2302_v58 }
 0x9dd   : > { %3875 = vrcp.f32 %v2293_v59 }
 0x9df   : > { %v2296_v36 = vpop.xlane.xlu0 %2295  ;;  %v2410_v61 = vpop.permute.xlu1 %2409 }
 0x9e0   : > { %3877 = vrcp.f32 %v2296_v36  ;;  %v2415_v25 = vsel %vm1682_vm7, %v2410_v61, 0 }
 0x9e3   : > { %v2361_v60 = vpop.permute.xlu0 %2360  ;;  %v2461_v37 = vpop.permute.xlu1 %2460 }
 0x9e4   : > { %3663 = vmatpush3.bf16.msra.mxu0 %v2361_v60  ;;  %v2466_v17 = vsel %vm1682_vm7, %v2461_v37, 0 }
 0x9e5   : > { %3674 = vmatprep.subr.bf16.mxu0 %v3924_v54  ;;  %v3872_v10 = vpop.eup %3871 }
 0x9e6   : > { %v2309_v0 = vmul.f32 %v3872_v10, %v3864_v51 }
 0x9e7   : > { %v2459_v27 = vpop.permute.xlu1 %2458  ;;  %v2408_v28 = vpop.permute.xlu0 %2407 }
 0x9e9   : > { %v3874_v2 = vpop.eup %3873 }
 0x9ea   : > { %v2310_v1 = vmul.f32 %v3874_v2, %v3868_v53  ;;  %v3876_v8 = vpop.eup %3875 }
 0x9eb   : > { %v2307_v21 = vmul.f32 %v3876_v8, %v3866_v52 }
 0x9ec   : > { %v2312_v6 = vpack.c.bf16 %v2310_v1, %v2309_v0 }
 0x9ed   : > { %v3878_v13 = vpop.eup %3877 }
 0x9ee   : > { %3665 = vmatmul.mubr.msk.bf16.vlgmr.msra.gmra.mxu0 %vm1780_vm8, %v2312_v6  ;;  %v2308_v22 = vmul.f32 %v3878_v13, %v3870_v55 }
 0x9ef   : > { %3675 = vmatpush3.bf16.xpose.msra.mxu0 %v2466_v17  ;;  %3676 = vmatprep.mubr.msk.bf16.mxu0 %vm3925_vm6, %v3924_v54 }
 0x9f0   : > { %v2311_v24 = vpack.c.bf16 %v2308_v22, %v2307_v21  ;;  %3686 = vmatprep.subr.bf16.mxu0 %v3924_v54 }
 0x9f2   : > { %3659 = vmatmul.mubr.msk.bf16.vlgmr.msra.gmra.mxu1 %vm1780_vm8, %v2311_v24 }
 0x9f3   : > { %3669 = vmatpush3.bf16.xpose.msra.mxu1 %v2415_v25  ;;  %3670 = vmatprep.mubr.msk.bf16.mxu1 %vm3925_vm6, %v3924_v54 }
 0x9f4   : > { %3680 = vmatprep.subr.bf16.mxu1 %v3924_v54 }
 0x9f6   : > { %3677 = vmatmul.mubr.msk.bf16.vlgmr.msra.gmra.mxu0 %vm1682_vm7, %v2459_v27  ;;  %v3823_v27 = vld [vmem:[%s4650_s30 + $0x8] sm:$0xff]  }
 0x9f7   : > { %3688 = vmatprep.mubr.msk.bf16.mxu0 %vm3925_vm6, %v3924_v54 }
 0x9fa   : > { %3671 = vmatmul.mubr.msk.bf16.vlgmr.msra.gmra.mxu1 %vm1682_vm7, %v2408_v28  ;;  %v3824_v28 = vld [vmem:[%s4650_s30] sm:$0xff]  }
 0x9fb   : > { %3682 = vmatprep.mubr.msk.bf16.mxu1 %vm3925_vm6, %v3924_v54 }
 0xaae   : > { %v2400_v29 = vpop.f32.mrf.mxu0 }
 0xab0   : > { %v3666_v62 = vpop.f32.mrf.mxu0 }
 0xab2   : > { %v2353_v30 = vpop.f32.mrf.mxu1  ;;  %v2403_v31 = vpop.f32.mrf.mxu0 }
 0xab3   : > { %v3806_v32 = vpack.i.bf16 %v2403_v31, %v2400_v29 }
 0xab4   : > { %v3660_v33 = vpop.f32.mrf.mxu1  ;;  %v3667_v34 = vpop.f32.mrf.mxu0 }
 0xab6   : > { %v2356_v38 = vpop.f32.mrf.mxu1  ;;  %v2502_v39 = vpop.f32.mrf.mxu0 }
 0xab7   : > { %v3801_v3 = vpack.i.bf16 %v2356_v38, %v2353_v30  ;;  %v2515_v56 = vsel %vm1780_vm8, %v2502_v39, -inf }
 0xab8   : > { %v3661_v40 = vpop.f32.mrf.mxu1  ;;  %v3678_v35 = vpop.f32.mrf.mxu0 }
 0xaba   : > { %v2451_v42 = vpop.f32.mrf.mxu1  ;;  %v2505_v44 = vpop.f32.mrf.mxu0 }
 0xabb   : > { %v2509_v45 = vsel %vm1780_vm8, %v2451_v42, -inf  ;;  %v2518_v46 = vsel %vm1780_vm8, %v2505_v44, -inf }
 0xabc   : > { %v3679_v9 = vpop.f32.mrf.mxu0  ;;  %2510 = vmax.xlane.f32.xlu0 %v2509_v45  ;;  %v3672_v47 = vpop.f32.mrf.mxu1 }
 0xabe   : > { %v2454_v54 = vpop.f32.mrf.mxu1 }
 0xabf   : > { %v2512_v48 = vsel %vm1780_vm8, %v2454_v54, -inf }
 0xac0   : > { %2516 = vmax.xlane.f32.xlu0 %v2515_v56  ;;  %2513 = vmax.xlane.f32.xlu1 %v2512_v48  ;;  %v3673_v49 = vpop.f32.mrf.mxu1 }
 0xac4   : > { %2519 = vmax.xlane.f32.xlu0 %v2518_v46 }
 0xb45   : > { %v2511_v50 = vpop.xlane.xlu0 %2510 }
 0xb46   : > { %v2521_v51 = vsub.f32 %v2451_v42, %v2511_v50 }
 0xb48   : > { %v2525_v63 = vmul.f32 1.442695, %v2521_v51 }
 0xb49   : > { %v2517_v14 = vpop.xlane.xlu0 %2516  ;;  %v2514_v52 = vpop.xlane.xlu1 %2513 }
 0xb4a   : > { %v2523_v53 = vsub.f32 %v2502_v39, %v2517_v14  ;;  %v2522_v55 = vsub.f32 %v2454_v54, %v2514_v52 }
 0xb4c   : > { %v2529_v41 = vmul.f32 1.442695, %v2523_v53  ;;  %v2527_v58 = vmul.f32 1.442695, %v2522_v55 }
 0xb4d   : > { %v2520_v5 = vpop.xlane.xlu0 %2519 }
 0xb4e   : > { %3879 = vpow2.f32 %v2529_v41  ;;  %v2524_v57 = vsub.f32 %v2505_v44, %v2520_v5 }
 0xb4f   : > { %3881 = vpow2.f32 %v2525_v63 }
 0xb50   : > { %v2531_v59 = vmul.f32 1.442695, %v2524_v57 }
 0xb52   : > { %3883 = vpow2.f32 %v2531_v59 }
 0xb53   : > { %3885 = vpow2.f32 %v2527_v58 }
 0xb5b   : > { %v3880_v36 = vpop.eup %3879 }
 0xb5c   : > { %v2539_v60 = vsel %vm1780_vm8, %v3880_v36, 0.0  ;;  %v3882_v61 = vpop.eup %3881 }
 0xb5d   : > { %2540 = vadd.xlane.f32.xlu1 %v2539_v60  ;;  %v2533_v0 = vsel %vm1780_vm8, %v3882_v61, 0.0 }
 0xb5f   : > { %v3884_v10 = vpop.eup %3883 }
 0xb60   : > { %v2542_v2 = vsel %vm1780_vm8, %v3884_v10, 0.0  ;;  %v3886_v1 = vpop.eup %3885 }
 0xb61   : > { %2543 = vadd.xlane.f32.xlu0 %v2542_v2  ;;  %2534 = vadd.xlane.f32.xlu1 %v2533_v0  ;;  %v2536_v8 = vsel %vm1780_vm8, %v3886_v1, 0.0  ;;  %v3413_v0 = vld [vmem:[%s4651_s26] ss:$0 sm:$0xff]  ;;  %s4654_s26 = scalar_lea.vmem %s4626_s16, %s4053_s29 }
 0xb65   : > { %2537 = vadd.xlane.f32.xlu0 %v2536_v8 }
 0xb72   : > { %2555 = vrot.lane.b32.xlu1 %v4356_v43, %s3936_s18 }
 0xb76   : > { %3792 = vrot.lane.b32.xlu1 %v3791_v26, %s3937_s1 }
 0xb7a   : > { %3797 = vrot.lane.b32.xlu1 %v3796_v20, %s3937_s1  ;;  %s4653_s1 = scalar_lea.vmem %s4620_s10, %s4053_s29  ;;  %s3940_s29 = smov (!%p3434_p5), 32  }
 0xb7b   : > { %2602 = vrot.lane.b32.xlu0 %v4361_v7, %s3936_s18 }
 0xb7e   : > { %3807 = vrot.lane.b32.xlu1 %v3806_v32, %s3938_s19 }
 0xb7f   : > { %3802 = vrot.lane.b32.xlu0 %v3801_v3, %s3938_s19 }
 0xbe6   : > { %v2541_v37 = vpop.xlane.xlu1 %2540 }
 0xbe7   : > { %3887 = vrcp.f32 %v2541_v37 }
 0xbea   : > { %v2544_v6 = vpop.xlane.xlu0 %2543  ;;  %v2535_v13 = vpop.xlane.xlu1 %2534 }
 0xbeb   : > { %3889 = vrcp.f32 %v2544_v6 }
 0xbec   : > { %3891 = vrcp.f32 %v2535_v13  ;;  %v3911_v13 = vld [vmem:[#allocation2] sm:$0xff] }
 0xbee   : > { %v2538_v43 = vpop.xlane.xlu0 %2537  ;;  %v2556_v17 = vpop.permute.xlu1 %2555 }
 0xbef   : > { %3893 = vrcp.f32 %v2538_v43  ;;  %3681 = vmatpush3.bf16.msra.mxu1 %v2556_v17 }
 0xbf0   : > { %3692 = vmatprep.subr.bf16.mxu1 %v3823_v27 }
 0xbf2   : > { %v2603_v18 = vpop.permute.xlu0 %2602  ;;  %v3793_v40 = vpop.permute.xlu1 %3792 }
 0xbf3   : > { %3687 = vmatpush3.bf16.msra.mxu0 %v2603_v18  ;;  %v3795_v45 = vunpack.i.h.bf16 %v3793_v40  ;;  %v3794_v9 = vunpack.i.l.bf16 %v3793_v40 }
 0xbf4   : > { %v3888_v16 = vpop.eup %3887 }
 0xbf5   : > { %v2551_v20 = vmul.f32 %v3888_v16, %v3880_v36  ;;  %v2698_v52 = vsel %vm1682_vm7, %v4414_v15, %v3795_v45  ;;  %v2697_v53 = vsel %vm1682_vm7, %v4410_v11, %v3794_v9 }
 0xbf6   : > { %v3798_v35 = vpop.permute.xlu1 %3797  ;;  %v3803_v44 = vpop.permute.xlu0 %3802 }
 0xbf7   : > { %v3800_v47 = vunpack.i.h.bf16 %v3798_v35  ;;  %v3799_v54 = vunpack.i.l.bf16 %v3798_v35  ;;  %v3805_v46 = vunpack.i.h.bf16 %v3803_v44  ;;  %v3804_v50 = vunpack.i.l.bf16 %v3803_v44 }
 0xbf8   : > { %v3890_v19 = vpop.eup %3889 }
 0xbf9   : > { %v3892_v7 = vpop.eup %3891  ;;  %v2552_v23 = vmul.f32 %v3890_v19, %v3884_v10  ;;  %v2700_v63 = vsel %vm1682_vm7, %v4412_v12, %v3800_v47  ;;  %v2699_v41 = vsel %vm1682_vm7, %v4408_v4, %v3799_v54  ;;  %v2701_v36 = vsel %vm1780_vm8, %v2697_v53, %v3804_v50 }
 0xbfa   : > { %v2549_v22 = vmul.f32 %v3892_v7, %v3882_v61  ;;  %v3808_v42 = vpop.permute.xlu1 %3807  ;;  %v2702_v15 = vsel %vm1780_vm8, %v2698_v52, %v3805_v46  ;;  %v3912_v7 = vld [vmem:[#allocation2 + $0x10] sm:$0xff]  ;;  %v3827_v46 = vld [vmem:[%s4095_s27 + $0x18] sm:$0xff]  }
 0xbfb   : > { %v2554_v21 = vpack.c.bf16 %v2552_v23, %v2551_v20  ;;  %v3810_v56 = vunpack.i.h.bf16 %v3808_v42  ;;  %v3809_v48 = vunpack.i.l.bf16 %v3808_v42  ;;  %v3913_v23 = vld [vmem:[#allocation2 + $0x8] sm:$0xff] }
 0xbfc   : > { %v3894_v26 = vpop.eup %3893 }
 0xbfd   : > { %v2550_v24 = vmul.f32 %v3894_v26, %v3886_v1  ;;  %3689 = vmatmul.mubr.msk.bf16.vlgmr.msra.gmra.mxu0 %vm1780_vm8, %v2554_v21  ;;  %v2703_v5 = vsel %vm1780_vm8, %v2699_v41, %v3809_v48  ;;  %v2704_v57 = vsel %vm1780_vm8, %v2700_v63, %v3810_v56  ;;  %v3825_v48 = vld [vmem:[%s4085_s5 + $0x8] sm:$0xff]  }
 0xbfe   : > { %3700 = vmatprep.subr.bf16.mxu0 %v3825_v48 }
 0xbff   : > { %v2553_v25 = vpack.c.bf16 %v2550_v24, %v2549_v22  ;;  %v3914_v24 = vld [vmem:[#allocation2 + $0x18] sm:$0xff]  ;;  %3701 = vmatpush3.bf16.msra.mxu0 %v3825_v48 }
 0xc01   : > { %3683 = vmatmul.mubr.msk.bf16.vlgmr.msra.gmra.mxu1 %vm1780_vm8, %v2553_v25 }
 0xc02   : > { %3693 = vmatpush3.bf16.msra.mxu1 %v3823_v27 }
 0xc03   : > { %3694 = vmatprep.subr.bf16.mxu1 %v3824_v28 }
 0xc06   : > { %3695 = vmatpush3.bf16.msra.mxu1 %v3824_v28 }
 0xc07   : > { %3708 = vmatprep.subr.bf16.mxu1 %v3827_v46 }
 0xcbd   : > { %v2642_v29 = vpop.f32.mrf.mxu0 }
 0xcbf   : > { %v3690_v62 = vpop.f32.mrf.mxu0 }
 0xcc1   : > { %v2595_v30 = vpop.f32.mrf.mxu1  ;;  %v2645_v31 = vpop.f32.mrf.mxu0 }
 0xcc2   : > { %v3816_v32 = vpack.i.bf16 %v2645_v31, %v2642_v29 }
 0xcc3   : > { %v3684_v33 = vpop.f32.mrf.mxu1  ;;  %v3691_v34 = vpop.f32.mrf.mxu0 }
 0xcc4   : > { %3817 = vrot.lane.b32.xlu1 %v3816_v32, %s3939_s21 }
 0xcc5   : > { %v2598_v38 = vpop.f32.mrf.mxu1 }
 0xcc6   : > { %v3811_v39 = vpack.i.bf16 %v2598_v38, %v2595_v30 }
 0xcc7   : > { %v3685_v3 = vpop.f32.mrf.mxu1 }
 0xcc8   : > { %3812 = vrot.lane.b32.xlu0 %v3811_v39, %s3939_s21 }
 0xd36   : > { %v3818_v49 = vpop.permute.xlu1 %3817 }
 0xd37   : > { %v3820_v51 = vunpack.i.h.bf16 %v3818_v49  ;;  %v3819_v14 = vunpack.i.l.bf16 %v3818_v49  ;;  %v3826_v49 = vld [vmem:[%s4085_s5] sm:$0xff]   ;;  %s3942_s5 = smov (!%p3434_p5), 64  }
 0xd38   : > { %3702 = vmatprep.subr.bf16.mxu0 %v3826_v49 }
 0xd39   : > { %v2708_v60 = vsel %vm2705_vm9, %v2703_v5, %v3819_v14  ;;  %v2709_v11 = vsel %vm2705_vm9, %v2704_v57, %v3820_v51  ;;  %3703 = vmatpush3.bf16.msra.mxu0 %v3826_v49 }
 0xd3a   : > { %v3813_v55 = vpop.permute.xlu0 %3812  ;;  %v2711_v2 = vpack.c.bf16 %v2709_v11, %v2708_v60  ;;  %v3418_v60 = vld [vmem:[%s4652_s22] ss:$0 sm:$0xff] }
 0xd3b   : > { %v3815_v58 = vunpack.i.h.bf16 %v3813_v55  ;;  %v3814_v59 = vunpack.i.l.bf16 %v3813_v55 }
 0xd3d   : > { %v2707_v61 = vsel %vm2705_vm9, %v2702_v15, %v3815_v58  ;;  %v2706_v10 = vsel %vm2705_vm9, %v2701_v36, %v3814_v59 }
 0xd3e   : > { %v2710_v12 = vpack.c.bf16 %v2707_v61, %v2706_v10 }
 0xd40   : > { %3696 = vmatprep.mubr.msk.bf16.mxu1 %vm1615_vm5, %v2710_v12 }
 0xd41   : > { %3697 = vmatmul.mubr.msk.bf16.vlgmr.msra.gmra.mxu1 %vm1615_vm5, %v2711_v2 }
 0xd42   : > { %3709 = vmatpush3.bf16.msra.mxu1 %v3827_v46 }
 0xe01   : > { %v3698_v4 = vpop.f32.mrf.mxu1 }
 0xe02   : > { %v2784_v8 = vadd.f32 %v3698_v4, %v3413_v0  ;;  %v3419_v4 = vld [vmem:[%s4653_s1] ss:$0 sm:$0xff] }
 0xe03   : > { %v2775_v1 = vpop.f32.mrf.mxu1 }
 0xe04   : > { %v2776_v37 = vadd.f32 %v3413_v0, %v2775_v1  ;;  %v2792_v20 = vadd.f32 %v3912_v7, %v2784_v8  ;;  %v3828_v7 = vld [vmem:[%s4095_s27 + $0x10] sm:$0xff]  }
 0xe05   : > { %v3699_v6 = vpop.f32.mrf.mxu1  ;;  %3710 = vmatprep.subr.bf16.mxu1 %v3828_v7 }
 0xe06   : > { %v2790_v43 = vadd.f32 %v3911_v13, %v2776_v37  ;;  %v2787_v18 = vadd.f32 %v3699_v6, %v3413_v0  ;;  %v2802_v22 = vsel %vm1615_vm5, %v2792_v20, 0.0  ;;  %3711 = vmatpush3.bf16.msra.mxu1 %v3828_v7 }
 0xe07   : > { %v2778_v17 = vpop.f32.mrf.mxu1 }
 0xe08   : > { %v2779_v16 = vadd.f32 %v3413_v0, %v2778_v17  ;;  %v2796_v19 = vsel %vm1615_vm5, %v2790_v43, 0.0  ;;  %v2793_v25 = vadd.f32 %v3914_v24, %v2787_v18 }
 0xe09   : > { %2797 = vadd.xlane.f32.xlu0 %v2796_v19 }
 0xe0a   : > { %v2791_v26 = vadd.f32 %v3913_v23, %v2779_v16  ;;  %v2805_v27 = vsel %vm1615_vm5, %v2793_v25, 0.0  ;;  %v3830_v23 = vld [vmem:[%s4095_s27] sm:$0xff]  }
 0xe0c   : > { %v2799_v21 = vsel %vm1615_vm5, %v2791_v26, 0.0 }
 0xe0d   : > { %2800 = vadd.xlane.f32.xlu1 %v2799_v21  ;;  %2803 = vadd.xlane.f32.xlu0 %v2802_v22  ;;  %v3420_v22 = vld [vmem:[%s716_s7] ss:$0 sm:$0xff] }
 0xe11   : > { %2806 = vadd.xlane.f32.xlu0 %v2805_v27 }
 0xe92   : > { %v2798_v28 = vpop.xlane.xlu0 %2797 }
 0xe93   : > { %v2809_v29 = vmul.f32 0.03125, %v2798_v28 }
 0xe95   : > { %v2813_v62 = vsub.f32 %v2790_v43, %v2809_v29 }
 0xe96   : > { %v2801_v30 = vpop.xlane.xlu1 %2800  ;;  %v2804_v31 = vpop.xlane.xlu0 %2803 }
 0xe97   : > { %v2810_v32 = vmul.f32 0.03125, %v2801_v30  ;;  %v2811_v33 = vmul.f32 0.03125, %v2804_v31  ;;  %v2817_v34 = vmul.f32 %v2813_v62, %v2813_v62 }
 0xe99   : > { %v2814_v38 = vsub.f32 %v2791_v26, %v2810_v32  ;;  %v2815_v39 = vsub.f32 %v2792_v20, %v2811_v33  ;;  %v2821_v3 = vsel %vm1615_vm5, %v2817_v34, 0.0  ;;  %v3829_v20 = vld [vmem:[%s4095_s27 + $0x8] sm:$0xff]  }
 0xe9a   : > { %2822 = vadd.xlane.f32.xlu1 %v2821_v3  ;;  %v2807_v40 = vpop.xlane.xlu0 %2806  ;;  %3712 = vmatprep.subr.bf16.mxu1 %v3829_v20  ;;  %v3425_v3 = vld [vmem:[%s724_s0] ss:$0 sm:$0xff] }
 0xe9b   : > { %v2812_v35 = vmul.f32 0.03125, %v2807_v40  ;;  %v2818_v42 = vmul.f32 %v2814_v38, %v2814_v38  ;;  %v2819_v44 = vmul.f32 %v2815_v39, %v2815_v39  ;;  %3713 = vmatpush3.bf16.msra.mxu1 %v3829_v20 }
 0xe9c   : > { %3714 = vmatprep.subr.bf16.mxu1 %v3830_v23 }
 0xe9d   : > { %v2816_v45 = vsub.f32 %v2793_v25, %v2812_v35  ;;  %v2824_v9 = vsel %vm1615_vm5, %v2818_v42, 0.0  ;;  %v2827_v47 = vsel %vm1615_vm5, %v2819_v44, 0.0 }
 0xe9e   : > { %2825 = vadd.xlane.f32.xlu0 %v2824_v9  ;;  %2828 = vadd.xlane.f32.xlu1 %v2827_v47 }
 0xe9f   : > { %v2820_v54 = vmul.f32 %v2816_v45, %v2816_v45  ;;  %3715 = vmatpush3.bf16.msra.mxu1 %v3830_v23 }
 0xea1   : > { %v2830_v56 = vsel %vm1615_vm5, %v2820_v54, 0.0 }
 0xea2   : > { %2831 = vadd.xlane.f32.xlu0 %v2830_v56 }
 0xf23   : > { %v2823_v50 = vpop.xlane.xlu1 %2822 }
 0xf24   : > { %v2833_v51 = vmul.f32 0.03125, %v2823_v50 }
 0xf26   : > { %v2837_v14 = vadd.f32 1e-05, %v2833_v51 }
 0xf27   : > { %v2829_v52 = vpop.xlane.xlu1 %2828  ;;  %v2826_v53 = vpop.xlane.xlu0 %2825 }
 0xf28   : > { %3895 = vrsqrt.f32 %v2837_v14  ;;  %v2835_v63 = vmul.f32 0.03125, %v2829_v52  ;;  %v2834_v41 = vmul.f32 0.03125, %v2826_v53 }
 0xf2a   : > { %v2839_v55 = vadd.f32 1e-05, %v2835_v63  ;;  %v2838_v5 = vadd.f32 1e-05, %v2834_v41 }
 0xf2b   : > { %v2832_v57 = vpop.xlane.xlu0 %2831 }
 0xf2c   : > { %3897 = vrsqrt.f32 %v2839_v55  ;;  %v2836_v58 = vmul.f32 0.03125, %v2832_v57 }
 0xf2d   : > { %3899 = vrsqrt.f32 %v2838_v5 }
 0xf2e   : > { %v2840_v59 = vadd.f32 1e-05, %v2836_v58 }
 0xf30   : > { %3901 = vrsqrt.f32 %v2840_v59 }
 0xf35   : > { %v3896_v36 = vpop.eup %3895 }
 0xf36   : > { %v2845_v15 = vmul.f32 %v3896_v36, %v2813_v62 }
 0xf38   : > { %v2855_v2 = vmul.f32 %v3418_v60, %v2845_v15 }
 0xf39   : > { %v3898_v11 = vpop.eup %3897 }
 0xf3a   : > { %v3900_v61 = vpop.eup %3899  ;;  %v2847_v10 = vmul.f32 %v3898_v11, %v2815_v39  ;;  %v2865_v6 = vadd.f32 %v3419_v4, %v2855_v2 }
 0xf3b   : > { %v2846_v12 = vmul.f32 %v3900_v61, %v2814_v38 }
 0xf3c   : > { %v2857_v37 = vmul.f32 %v3418_v60, %v2847_v10 }
 0xf3d   : > { %v3902_v0 = vpop.eup %3901  ;;  %v2856_v1 = vmul.f32 %v3418_v60, %v2846_v12 }
 0xf3e   : > { %v2848_v8 = vmul.f32 %v3902_v0, %v2816_v45  ;;  %v2867_v18 = vadd.f32 %v3419_v4, %v2857_v37 }
 0xf3f   : > { %v2866_v13 = vadd.f32 %v3419_v4, %v2856_v1 }
 0xf40   : > { %v2858_v43 = vmul.f32 %v3418_v60, %v2848_v8 }
 0xf41   : > { %v2869_v17 = vpack.c.bf16 %v2866_v13, %v2865_v6 }
 0xf42   : > { %v2868_v16 = vadd.f32 %v3419_v4, %v2858_v43 }
 0xf43   : > { %3704 = vmatprep.mubr.msk.bf16.mxu0 %vm1615_vm5, %v2869_v17 }
 0xf44   : > { %v2870_v19 = vpack.c.bf16 %v2868_v16, %v2867_v18 }
 0xf46   : > { %3705 = vmatmul.mubr.msk.bf16.vlgmr.msra.gmra.mxu0 %vm1615_vm5, %v2870_v19 }
0x1006   : > { %v3706_v26 = vpop.f32.mrf.mxu0 }
0x1007   : > { %v2943_v28 = vadd.f32 %v3706_v26, %v3420_v22 }
0x1008   : > { %v2934_v21 = vpop.f32.mrf.mxu0 }
0x1009   : > { %v2935_v25 = vadd.f32 %v3420_v22, %v2934_v21  ;;  %v2951_v33 = vmax.f32 %v2943_v28, 0.0  ;;  %v3432_v21 = vld [vmem:[%s727_s20] ss:$0 sm:$0xff]  ;;  %s3941_s20 = smov (!%p3434_p5), 96  }
0x100a   : > { %v3707_v24 = vpop.f32.mrf.mxu0 }
0x100b   : > { %v2946_v27 = vadd.f32 %v3707_v24, %v3420_v22  ;;  %v2949_v31 = vmax.f32 %v2935_v25, 0.0  ;;  %v3433_v24 = vld [vmem:[%s4654_s26] ss:$0 sm:$0xff] }
0x100c   : > { %v2937_v29 = vpop.f32.mrf.mxu0 }
0x100d   : > { %v2938_v62 = vadd.f32 %v3420_v22, %v2937_v29  ;;  %v2952_v30 = vmax.f32 %v2946_v27, 0.0 }
0x100f   : > { %v2950_v32 = vmax.f32 %v2938_v62, 0.0  ;;  %v2954_v38 = vpack.c.bf16 %v2952_v30, %v2951_v33 }
0x1011   : > { %v2953_v34 = vpack.c.bf16 %v2950_v32, %v2949_v31 }
0x1013   : > { %3716 = vmatprep.mubr.msk.bf16.mxu1 %vm2994_vm10, %v2953_v34 }
0x1014   : > { %3717 = vmatmul.mubr.msk.bf16.vlgmr.msra.gmra.mxu1 %vm2994_vm10, %v2954_v38 }
0x10d4   : > { %v3718_v39 = vpop.f32.mrf.mxu1 }
0x10d5   : > { %v3044_v35 = vadd.f32 %v3718_v39, %v3425_v3 }
0x10d6   : > { %v3035_v40 = vpop.f32.mrf.mxu1 }
0x10d7   : > { %v3036_v42 = vadd.f32 %v3425_v3, %v3035_v40  ;;  %v3052_v48 = vadd.f32 %v3044_v35, %v2867_v18 }
0x10d8   : > { %v3719_v44 = vpop.f32.mrf.mxu1 }
0x10d9   : > { %v3050_v45 = vadd.f32 %v3036_v42, %v2865_v6  ;;  %v3047_v47 = vadd.f32 %v3719_v44, %v3425_v3  ;;  %v3062_v50 = vsel %vm1615_vm5, %v3052_v48, 0.0 }
0x10da   : > { %v3038_v9 = vpop.f32.mrf.mxu1 }
0x10db   : > { %v3039_v54 = vadd.f32 %v3425_v3, %v3038_v9  ;;  %v3056_v56 = vsel %vm1615_vm5, %v3050_v45, 0.0  ;;  %v3053_v51 = vadd.f32 %v3047_v47, %v2868_v16 }
0x10dc   : > { %3057 = vadd.xlane.f32.xlu1 %v3056_v56 }
0x10dd   : > { %v3051_v49 = vadd.f32 %v3039_v54, %v2866_v13  ;;  %v3065_v14 = vsel %vm1615_vm5, %v3053_v51, 0.0 }
0x10df   : > { %v3059_v46 = vsel %vm1615_vm5, %v3051_v49, 0.0 }
0x10e0   : > { %3060 = vadd.xlane.f32.xlu0 %v3059_v46  ;;  %3063 = vadd.xlane.f32.xlu1 %v3062_v50 }
0x10e4   : > { %3066 = vadd.xlane.f32.xlu0 %v3065_v14 }
0x1165   : > { %v3058_v52 = vpop.xlane.xlu1 %3057 }
0x1166   : > { %v3068_v53 = vmul.f32 0.03125, %v3058_v52 }
0x1168   : > { %v3072_v63 = vsub.f32 %v3050_v45, %v3068_v53 }
0x1169   : > { %v3061_v41 = vpop.xlane.xlu0 %3060  ;;  %v3064_v55 = vpop.xlane.xlu1 %3063 }
0x116a   : > { %v3069_v5 = vmul.f32 0.03125, %v3061_v41  ;;  %v3070_v57 = vmul.f32 0.03125, %v3064_v55  ;;  %v3076_v58 = vmul.f32 %v3072_v63, %v3072_v63 }
0x116c   : > { %v3073_v59 = vsub.f32 %v3051_v49, %v3069_v5  ;;  %v3074_v36 = vsub.f32 %v3052_v48, %v3070_v57  ;;  %v3080_v15 = vsel %vm1615_vm5, %v3076_v58, 0.0 }
0x116d   : > { %v3067_v60 = vpop.xlane.xlu0 %3066  ;;  %3081 = vadd.xlane.f32.xlu1 %v3080_v15 }
0x116e   : > { %v3071_v11 = vmul.f32 0.03125, %v3067_v60  ;;  %v3077_v61 = vmul.f32 %v3073_v59, %v3073_v59  ;;  %v3078_v10 = vmul.f32 %v3074_v36, %v3074_v36 }
0x1170   : > { %v3075_v12 = vsub.f32 %v3053_v51, %v3071_v11  ;;  %v3083_v2 = vsel %vm1615_vm5, %v3077_v61, 0.0  ;;  %v3086_v4 = vsel %vm1615_vm5, %v3078_v10, 0.0 }
0x1171   : > { %3084 = vadd.xlane.f32.xlu0 %v3083_v2  ;;  %3087 = vadd.xlane.f32.xlu1 %v3086_v4 }
0x1172   : > { %v3079_v0 = vmul.f32 %v3075_v12, %v3075_v12 }
0x1174   : > { %v3089_v1 = vsel %vm1615_vm5, %v3079_v0, 0.0 }
0x1175   : > { %3090 = vadd.xlane.f32.xlu0 %v3089_v1 }
0x11f6   : > { %v3082_v8 = vpop.xlane.xlu1 %3081 }
0x11f7   : > { %v3092_v37 = vmul.f32 0.03125, %v3082_v8 }
0x11f9   : > { %v3096_v6 = vadd.f32 1e-05, %v3092_v37 }
0x11fa   : > { %v3085_v13 = vpop.xlane.xlu0 %3084  ;;  %v3088_v43 = vpop.xlane.xlu1 %3087 }
0x11fb   : > { %3903 = vrsqrt.f32 %v3096_v6  ;;  %v3093_v17 = vmul.f32 0.03125, %v3085_v13  ;;  %v3094_v18 = vmul.f32 0.03125, %v3088_v43 }
0x11fd   : > { %v3097_v16 = vadd.f32 1e-05, %v3093_v17  ;;  %v3098_v19 = vadd.f32 1e-05, %v3094_v18 }
0x11fe   : > { %v3091_v7 = vpop.xlane.xlu0 %3090 }
0x11ff   : > { %3905 = vrsqrt.f32 %v3097_v16  ;;  %v3095_v20 = vmul.f32 0.03125, %v3091_v7 }
0x1200   : > { %3907 = vrsqrt.f32 %v3098_v19 }
0x1201   : > { %v3099_v23 = vadd.f32 1e-05, %v3095_v20 }
0x1203   : > { %3909 = vrsqrt.f32 %v3099_v23 }
0x1208   : > { %v3904_v26 = vpop.eup %3903 }
0x1209   : > { %v3104_v22 = vmul.f32 %v3904_v26, %v3072_v63 }
0x120b   : > { %v3114_v25 = vmul.f32 %v3432_v21, %v3104_v22 }
0x120c   : > { %v3906_v27 = vpop.eup %3905 }
0x120d   : > { %v3908_v28 = vpop.eup %3907  ;;  %v3124_v29 = vadd.f32 %v3433_v24, %v3114_v25  ;;  %v3105_v62 = vmul.f32 %v3906_v27, %v3073_v59 }
0x120e   : > { %v3106_v30 = vmul.f32 %v3908_v28, %v3074_v36 }
0x120f   : > { %3128 = vst.msk [vmem:[#allocation2] sm:$0xff] %vm1615_vm5, %v3124_v29  ;;  %v3115_v31 = vmul.f32 %v3432_v21, %v3105_v62 }
0x1210   : > { %v3910_v32 = vpop.eup %3909  ;;  %v3116_v33 = vmul.f32 %v3432_v21, %v3106_v30 }
0x1211   : > { %v3125_v34 = vadd.f32 %v3433_v24, %v3115_v31  ;;  %v3107_v38 = vmul.f32 %v3910_v32, %v3075_v12 }
0x1212   : > { %v3126_v39 = vadd.f32 %v3433_v24, %v3116_v33 }
0x1213   : > { %3129 = vst.msk [vmem:[#allocation2 + $0x8] sm:$0xff] %vm1615_vm5, %v3125_v34  ;;  %v3117_v3 = vmul.f32 %v3432_v21, %v3107_v38  ;;  %3135 = sbr.rel (%p3434_p5) target bundleno = 4754 (0x1292), region = 96 }
0x1214   : > { %3130 = vst.msk [vmem:[#allocation2 + $0x10] sm:$0xff] %vm1615_vm5, %v3126_v39 }
0x1215   : > { %v3127_v40 = vadd.f32 %v3433_v24, %v3117_v3 }
0x1217   : > { %3131 = vst.msk [vmem:[#allocation2 + $0x18] sm:$0xff] %vm1615_vm5, %v3127_v40 }
0x1218   : > { %3137 = vrot.lane.b32.xlu0 %v3125_v34, %s3940_s29  ;;  %3145 = vrot.lane.b32.xlu1 %v3127_v40, %s3941_s20  ;;  %vm3150_vm11 = vcmask 785408  }
0x121c   : > { %3141 = vrot.lane.b32.xlu0 %v3126_v39, %s3942_s5 }
0x128a   : > { %v3138_v35 = vpop.permute.xlu0 %3137  ;;  %v3146_v42 = vpop.permute.xlu1 %3145 }
0x128b   : > { %v3148_v44 = vsel %vm1615_vm5, %v3124_v29, %v3138_v35 }
0x128e   : > { %v3142_v45 = vpop.permute.xlu0 %3141 }
0x128f   : > { %v3149_v9 = vsel %vm2994_vm10, %v3148_v44, %v3142_v45 }
0x1290   : > { %v3151_v47 = vsel %vm3150_vm11, %v3149_v9, %v3146_v42 }
0x1291   : > { %3152 = vst [vmem:[%s4655_s4] sm:$0xff] %v3151_v47 }
0x1292 PF: > { %p3435_p6 = scmp.ne.s32.totalorder %s4047_s28, 2 }
0x1293   : > { %s3943_s18 = smov (!%p3435_p6), 32   ;;  %s3944_s1 = smov (!%p3435_p6), 96  }
0x1294   : > { %3156 = sbr.rel (%p3435_p6) target bundleno = 4883 (0x1313), region = 100  ;;  %s3945_s19 = smov (!%p3435_p6), 64  }
0x1295   : > { %s4656_s27 = sld [smem:[#allocation11_spill]] (!%p3435_p6) }
0x1299   : > { %3158 = vrot.lane.b32.xlu0 %v3125_v34, %s3943_s18  ;;  %3166 = vrot.lane.b32.xlu1 %v3127_v40, %s3944_s1  ;;  %vm3171_vm12 = vcmask 785408  }
0x129d   : > { %3162 = vrot.lane.b32.xlu0 %v3126_v39, %s3945_s19 }
0x130b   : > { %v3159_v54 = vpop.permute.xlu0 %3158  ;;  %v3167_v56 = vpop.permute.xlu1 %3166 }
0x130c   : > { %v3169_v48 = vsel %vm1615_vm5, %v3124_v29, %v3159_v54 }
0x130f   : > { %v3163_v49 = vpop.permute.xlu0 %3162 }
0x1310   : > { %v3170_v46 = vsel %vm2994_vm10, %v3169_v48, %v3163_v49 }
0x1311   : > { %v3172_v50 = vsel %vm3171_vm12, %v3170_v46, %v3167_v56 }
0x1312   : > { %3173 = vst [vmem:[%s4656_s27] sm:$0xff] %v3172_v50 }
0x1313 PF: > { %s4657_s28 = sld [smem:[#allocation3_spill]] }
0x1319   : > { %s29_s27 = sadd.s32 1, %s4657_s28  }
0x131a   : > { %p26_p7 = scmp.ge.s32.totalorder %s29_s27, 5  }
0x131c   :  { %28 = sbr.rel (!%p26_p7) target bundleno = 9 (0x9), region = 174 }

</bundles_post_ra>
